<compile_context>
chip_gen: v6e
topology: v6e:2x2x1
jax: 0.10.0
libtpu: 0.0.40
codegen_flags: <defaults>
</compile_context>

<pallas_src>
import jax
import jax.numpy as jnp
from jax.experimental import pallas as pl
from jax.experimental.pallas import tpu as pltpu


MAX_LENGTH = 64
LATENT_DIM = 16
OUT_SLAB = 128        # packed output layout: [constrained(64) | latent(16) | zero pad(48)]
_NEG_BIG = -1e30      # b6 pad bias -> sigmoid(pad) == 0.0 exactly (replaces iota/where mask)


def _cdiv(a: int, d: int) -> int:
    return -(-a // d)


def _pick_batch_tile(b: int) -> int:
    """Batch-adaptive tile.

    Large enough to amortize the ~0.35 us per-grid-step overhead and fill the MXU M
    dimension (>= 256 rows), small enough that big batches still give >= 4 grid steps
    (>= 2 per TensorCore on v7x megacore) so HBM DMA pipelines behind compute.
    """
    b_aligned = _cdiv(b, 256) * 256
    tile = min(1024, b_aligned)
    while tile > 256 and _cdiv(b_aligned, tile) < 4:
        tile -= 256
    return tile


def _compressor_kernel(x_ref,
                       w1_ref, b1_ref, w2_ref, b2_ref, w3_ref, b3_ref,
                       w4_ref, b4_ref, w5_ref, b5_ref, w6_ref, b6_ref,
                       out_ref):
    """One batch tile: encoder -> decoder -> phi-constraint, packed 128-lane output.

    Matmuls: bf16 operands on the MXU with f32 accumulation + f32 bias add.
    Element-wise math stays f32 (v5e-safe); the live inter-layer tensors are cast
    once to bf16 so activation spill traffic is half-width on every chip.
    """

    def dense_f32(lhs_bf16, w_ref, b_ref):
        return jnp.dot(lhs_bf16, w_ref[...],
                       preferred_element_type=jnp.float32) + b_ref[...]

    def relu_bf16(h_f32):
        # ReLU in f32, then a single cast so the tensor carried to the next layer is bf16.
        return jnp.maximum(h_f32, 0.0).astype(jnp.bfloat16)

    x = x_ref[...]                                               # (TB, 64) bf16 straight from HBM

    # ---- encoder: Linear(64,128)+ReLU -> Linear(128,64)+ReLU -> Linear(64,16)+Tanh
    h = relu_bf16(dense_f32(x, w1_ref, b1_ref))                  # (TB, 128) bf16
    h = relu_bf16(dense_f32(h, w2_ref, b2_ref))                  # (TB, 64)  bf16
    # w3/b3 zero-padded to 128 output lanes -> lanes >= 16 are tanh(0) == 0 exactly.
    latent = jnp.tanh(dense_f32(h, w3_ref, b3_ref))              # (TB, 128) f32

    # ---- decoder: Linear(16,64)+ReLU -> Linear(64,128)+ReLU -> Linear(128,64)+Sigmoid
    # w4 zero-padded to 128 input rows, so feeding the 128-wide latent slab is exact.
    d = relu_bf16(dense_f32(latent.astype(jnp.bfloat16), w4_ref, b4_ref))   # (TB, 64) bf16
    d = relu_bf16(dense_f32(d, w5_ref, b5_ref))                  # (TB, 128) bf16
    # w6 zero-padded / b6 pad lanes biased to -1e30 -> sigmoid(pad) == 0.0 exactly,
    # so no iota/where masking of the pad lanes is needed.
    decoded = jax.nn.sigmoid(dense_f32(d, w6_ref, b6_ref))       # (TB, 128) f32

    # ---- phi-constraint mask (closed form of the PyTorch sequential loop):
    #   mask[:, 0] = 1;  mask[:, j] = 1 - decoded[:, j-1] * decoded[:, j]
    # Full-vreg lane rotate on the XLU; lane 0 receives pad lane 127 == 0 exactly,
    # so mask[:, 0] == 1 without an extra select.
    shifted = pltpu.roll(decoded, shift=1, axis=1)               # shifted[:, j] == decoded[:, j-1]
    constrained = decoded * (1.0 - shifted * decoded)

    # ---- pack [constrained(64) | latent(16) | 0(48)] into one lane-dense 128-wide store.
    # latent pad lanes (>= 16) are exactly 0, so the wrap-around of the roll is harmless.
    latent_rolled = pltpu.roll(latent, shift=MAX_LENGTH, axis=1)
    out_ref[...] = constrained + latent_rolled


@jax.jit
def neural_compressor_forward(x, params):
    """Encoder -> decoder -> phi-constraint in one Pallas kernel, batch tiled over the grid.

    x: (batch, MAX_LENGTH) float32
    params: dict of transposed weights (in, out) float32 and biases (1, out) float32
    Returns (constrained, latent) matching the PyTorch forward.
    """
    b = x.shape[0]
    tb = _pick_batch_tile(b)
    grid = _cdiv(b, tb)
    b_pad = grid * tb

    # bf16 input DMA: the kernel rounds x to bf16 before the first matmul anyway,
    # so casting in the wrapper is numerics-neutral and halves the input HBM stream.
    x_p = x.astype(jnp.bfloat16)
    if b_pad != b:
        x_p = jnp.pad(x_p, ((0, b_pad - b), (0, 0)))

    bf16, f32 = jnp.bfloat16, jnp.float32
    w1 = params["w1"].astype(bf16)
    w2 = params["w2"].astype(bf16)
    w3 = jnp.pad(params["w3"].astype(bf16), ((0, 0), (0, OUT_SLAB - LATENT_DIM)))
    w4 = jnp.pad(params["w4"].astype(bf16), ((0, OUT_SLAB - LATENT_DIM), (0, 0)))
    w5 = params["w5"].astype(bf16)
    w6 = jnp.pad(params["w6"].astype(bf16), ((0, 0), (0, OUT_SLAB - MAX_LENGTH)))
    b1 = params["b1"].astype(f32)
    b2 = params["b2"].astype(f32)
    b3 = jnp.pad(params["b3"].astype(f32), ((0, 0), (0, OUT_SLAB - LATENT_DIM)))
    b4 = params["b4"].astype(f32)
    b5 = params["b5"].astype(f32)
    # Pad lanes of b6 get a huge negative bias so sigmoid(pad) == 0.0 exactly.
    b6 = jnp.pad(params["b6"].astype(f32), ((0, 0), (0, OUT_SLAB - MAX_LENGTH)),
                 constant_values=_NEG_BIG)

    args = (x_p, w1, b1, w2, b2, w3, b3, w4, b4, w5, b5, w6, b6)

    # x / output tiles move over the grid; weights & biases keep block index (0, 0)
    # so Pallas leaves them VMEM-resident across grid steps (no re-DMA).
    in_specs = [pl.BlockSpec((tb, MAX_LENGTH), lambda i: (i, 0))]
    in_specs += [pl.BlockSpec(a.shape, lambda i: (0, 0)) for a in args[1:]]

    # Real flops/bytes so XLA schedules this small kernel sensibly.
    flops_per_row = 2 * (64 * 128 + 128 * 64 + 64 * 128
                         + 128 * 64 + 64 * 128 + 128 * 128)
    param_bytes = sum(int(a.size) * a.dtype.itemsize for a in args[1:])
    cost = pl.CostEstimate(
        flops=b_pad * flops_per_row,
        transcendentals=b_pad * 2 * OUT_SLAB,
        bytes_accessed=int(x_p.size) * 2 + b_pad * OUT_SLAB * 4 + param_bytes,
    )

    out = pl.pallas_call(
        _compressor_kernel,
        out_shape=jax.ShapeDtypeStruct((b_pad, OUT_SLAB), jnp.float32),
        grid=(grid,),
        in_specs=in_specs,
        out_specs=pl.BlockSpec((tb, OUT_SLAB), lambda i: (i, 0)),
        compiler_params=pltpu.CompilerParams(
            dimension_semantics=("parallel",)),
        cost_estimate=cost,
    )(*args)

    constrained = out[:b, :MAX_LENGTH]
    latent = out[:b, MAX_LENGTH:MAX_LENGTH + LATENT_DIM]
    return constrained, latent


def init_params(key):
    """Deterministic init mimicking PyTorch Linear default U(-1/sqrt(fan_in), +...).

    Weights stored transposed (in_features, out_features); biases as (1, out_features).
    """
    dims = [
        (MAX_LENGTH, 128),   # encoder L1
        (128, 64),           # encoder L2
        (64, LATENT_DIM),    # encoder L3
        (LATENT_DIM, 64),    # decoder L1
        (64, 128),           # decoder L2
        (128, MAX_LENGTH),   # decoder L3
    ]
    params = {}
    keys = jax.random.split(key, 2 * len(dims))
    for idx, (fan_in, fan_out) in enumerate(dims):
        bound = 1.0 / (fan_in ** 0.5)
        params[f"w{idx + 1}"] = jax.random.uniform(
            keys[2 * idx], (fan_in, fan_out), minval=-bound, maxval=bound,
            dtype=jnp.float32)
        params[f"b{idx + 1}"] = jax.random.uniform(
            keys[2 * idx + 1], (1, fan_out), minval=-bound, maxval=bound,
            dtype=jnp.float32)
    return params


def _reference_forward(x, p):
    """Pure-JAX reference mirroring the kernel's bf16-operand / f32-accumulate matmuls."""
    def dense(h, w, b):
        return jnp.dot(h.astype(jnp.bfloat16), w.astype(jnp.bfloat16),
                       preferred_element_type=jnp.float32) + b
    h = jnp.maximum(dense(x, p["w1"], p["b1"]), 0.0)
    h = jnp.maximum(dense(h, p["w2"], p["b2"]), 0.0)
    latent = jnp.tanh(dense(h, p["w3"], p["b3"]))
    d = jnp.maximum(dense(latent, p["w4"], p["b4"]), 0.0)
    d = jnp.maximum(dense(d, p["w5"], p["b5"]), 0.0)
    decoded = jax.nn.sigmoid(dense(d, p["w6"], p["b6"]))
    mask = jnp.concatenate(
        [jnp.ones((x.shape[0], 1), jnp.float32),
         1.0 - decoded[:, :-1] * decoded[:, 1:]], axis=1)
    return decoded * mask, latent


if __name__ == "__main__":
    key = jax.random.PRNGKey(0)
    k_params, k_x = jax.random.split(key)

    params = init_params(k_params)
    batch = 512   # two grid tiles of 256 -> exercises pipelining / megacore sharding
    # Binary-ish trace probabilities in [0, 1], matching the module's input domain.
    x = jax.random.uniform(k_x, (batch, MAX_LENGTH), dtype=jnp.float32)

    constrained, latent = neural_compressor_forward(x, params)
    jax.block_until_ready((constrained, latent))

    ref_constrained, ref_latent = _reference_forward(x, params)
    assert constrained.shape == (batch, MAX_LENGTH)
    assert latent.shape == (batch, LATENT_DIM)
    # Both kernel and reference use bf16 matmul operands with f32 accumulation, so the
    # comparison only needs to absorb reduction-order / transcendental lowering noise.
    assert jnp.allclose(constrained, ref_constrained, atol=2e-3, rtol=2e-3)
    assert jnp.allclose(latent, ref_latent, atol=2e-3, rtol=2e-3)

    print("KERNEL_OK")
</pallas_src>

<mosaic_0001>
module attributes {stable_mosaic.version = 11 : i64} {
  func.func @_compressor_kernel(%arg0: i32, %arg1: memref<256x64xbf16, #tpu.memory_space<vmem>>, %arg2: memref<64x128xbf16, #tpu.memory_space<vmem>>, %arg3: memref<1x128xf32, #tpu.memory_space<vmem>>, %arg4: memref<128x64xbf16, #tpu.memory_space<vmem>>, %arg5: memref<1x64xf32, #tpu.memory_space<vmem>>, %arg6: memref<64x128xbf16, #tpu.memory_space<vmem>>, %arg7: memref<1x128xf32, #tpu.memory_space<vmem>>, %arg8: memref<128x64xbf16, #tpu.memory_space<vmem>>, %arg9: memref<1x64xf32, #tpu.memory_space<vmem>>, %arg10: memref<64x128xbf16, #tpu.memory_space<vmem>>, %arg11: memref<1x128xf32, #tpu.memory_space<vmem>>, %arg12: memref<128x128xbf16, #tpu.memory_space<vmem>>, %arg13: memref<1x128xf32, #tpu.memory_space<vmem>>, %arg14: memref<256x128xf32, #tpu.memory_space<vmem>>) attributes {dimension_semantics = [#tpu.dimension_semantics<parallel>], iteration_bounds = array<i64: 2>, scalar_prefetch = 0 : i64, scratch_operands = 0 : i64, tpu.core_type = #tpu.core_type<tc>, window_params = [{transform_indices = @transform_0, window_bounds = array<i64: 256, 64>}, {pipeline_mode = #tpu.pipeline_mode<synchronous>, transform_indices = @transform_1, window_bounds = array<i64: 64, 128>}, {pipeline_mode = #tpu.pipeline_mode<synchronous>, transform_indices = @transform_2, window_bounds = array<i64: 1, 128>}, {pipeline_mode = #tpu.pipeline_mode<synchronous>, transform_indices = @transform_3, window_bounds = array<i64: 128, 64>}, {pipeline_mode = #tpu.pipeline_mode<synchronous>, transform_indices = @transform_4, window_bounds = array<i64: 1, 64>}, {pipeline_mode = #tpu.pipeline_mode<synchronous>, transform_indices = @transform_5, window_bounds = array<i64: 64, 128>}, {pipeline_mode = #tpu.pipeline_mode<synchronous>, transform_indices = @transform_6, window_bounds = array<i64: 1, 128>}, {pipeline_mode = #tpu.pipeline_mode<synchronous>, transform_indices = @transform_7, window_bounds = array<i64: 128, 64>}, {pipeline_mode = #tpu.pipeline_mode<synchronous>, transform_indices = @transform_8, window_bounds = array<i64: 1, 64>}, {pipeline_mode = #tpu.pipeline_mode<synchronous>, transform_indices = @transform_9, window_bounds = array<i64: 64, 128>}, {pipeline_mode = #tpu.pipeline_mode<synchronous>, transform_indices = @transform_10, window_bounds = array<i64: 1, 128>}, {pipeline_mode = #tpu.pipeline_mode<synchronous>, transform_indices = @transform_11, window_bounds = array<i64: 128, 128>}, {pipeline_mode = #tpu.pipeline_mode<synchronous>, transform_indices = @transform_12, window_bounds = array<i64: 1, 128>}, {transform_indices = @transform_13, window_bounds = array<i64: 256, 128>}]} {
    %c0 = arith.constant 0 : index
    %c0_0 = arith.constant 0 : index
    %0 = vector.load %arg1[%c0, %c0_0] : memref<256x64xbf16, #tpu.memory_space<vmem>>, vector<256x64xbf16>
    %c0_1 = arith.constant 0 : index
    %c0_2 = arith.constant 0 : index
    %1 = vector.load %arg2[%c0_1, %c0_2] : memref<64x128xbf16, #tpu.memory_space<vmem>>, vector<64x128xbf16>
    %cst = arith.constant dense<0.000000e+00> : vector<256x128xf32>
    %2 = tpu.matmul %0, %1, %cst {dimension_numbers = #tpu.dot_dimension_numbers<[1], [0], [0], [1], [0, 0, 1, 1], [], []>} : vector<256x64xbf16>, vector<64x128xbf16>, vector<256x128xf32> -> vector<256x128xf32>
    %c0_3 = arith.constant 0 : index
    %c0_4 = arith.constant 0 : index
    %3 = vector.load %arg3[%c0_3, %c0_4] : memref<1x128xf32, #tpu.memory_space<vmem>>, vector<1x128xf32>
    %4 = vector.broadcast %3 : vector<1x128xf32> to vector<256x128xf32>
    %5 = arith.addf %2, %4 : vector<256x128xf32>
    %cst_5 = arith.constant 0.000000e+00 : f32
    %6 = vector.broadcast %cst_5 : f32 to vector<256x128xf32>
    %7 = arith.maximumf %5, %6 : vector<256x128xf32>
    %8 = arith.truncf %7 : vector<256x128xf32> to vector<256x128xbf16>
    %c0_6 = arith.constant 0 : index
    %c0_7 = arith.constant 0 : index
    %9 = vector.load %arg4[%c0_6, %c0_7] : memref<128x64xbf16, #tpu.memory_space<vmem>>, vector<128x64xbf16>
    %cst_8 = arith.constant dense<0.000000e+00> : vector<256x64xf32>
    %10 = tpu.matmul %8, %9, %cst_8 {dimension_numbers = #tpu.dot_dimension_numbers<[1], [0], [0], [1], [0, 0, 1, 1], [], []>} : vector<256x128xbf16>, vector<128x64xbf16>, vector<256x64xf32> -> vector<256x64xf32>
    %c0_9 = arith.constant 0 : index
    %c0_10 = arith.constant 0 : index
    %11 = vector.load %arg5[%c0_9, %c0_10] : memref<1x64xf32, #tpu.memory_space<vmem>>, vector<1x64xf32>
    %12 = vector.broadcast %11 : vector<1x64xf32> to vector<256x64xf32>
    %13 = arith.addf %10, %12 : vector<256x64xf32>
    %cst_11 = arith.constant 0.000000e+00 : f32
    %14 = vector.broadcast %cst_11 : f32 to vector<256x64xf32>
    %15 = arith.maximumf %13, %14 : vector<256x64xf32>
    %16 = arith.truncf %15 : vector<256x64xf32> to vector<256x64xbf16>
    %c0_12 = arith.constant 0 : index
    %c0_13 = arith.constant 0 : index
    %17 = vector.load %arg6[%c0_12, %c0_13] : memref<64x128xbf16, #tpu.memory_space<vmem>>, vector<64x128xbf16>
    %cst_14 = arith.constant dense<0.000000e+00> : vector<256x128xf32>
    %18 = tpu.matmul %16, %17, %cst_14 {dimension_numbers = #tpu.dot_dimension_numbers<[1], [0], [0], [1], [0, 0, 1, 1], [], []>} : vector<256x64xbf16>, vector<64x128xbf16>, vector<256x128xf32> -> vector<256x128xf32>
    %c0_15 = arith.constant 0 : index
    %c0_16 = arith.constant 0 : index
    %19 = vector.load %arg7[%c0_15, %c0_16] : memref<1x128xf32, #tpu.memory_space<vmem>>, vector<1x128xf32>
    %20 = vector.broadcast %19 : vector<1x128xf32> to vector<256x128xf32>
    %21 = arith.addf %18, %20 : vector<256x128xf32>
    %22 = math.tanh %21 : vector<256x128xf32>
    %23 = arith.truncf %22 : vector<256x128xf32> to vector<256x128xbf16>
    %c0_17 = arith.constant 0 : index
    %c0_18 = arith.constant 0 : index
    %24 = vector.load %arg8[%c0_17, %c0_18] : memref<128x64xbf16, #tpu.memory_space<vmem>>, vector<128x64xbf16>
    %cst_19 = arith.constant dense<0.000000e+00> : vector<256x64xf32>
    %25 = tpu.matmul %23, %24, %cst_19 {dimension_numbers = #tpu.dot_dimension_numbers<[1], [0], [0], [1], [0, 0, 1, 1], [], []>} : vector<256x128xbf16>, vector<128x64xbf16>, vector<256x64xf32> -> vector<256x64xf32>
    %c0_20 = arith.constant 0 : index
    %c0_21 = arith.constant 0 : index
    %26 = vector.load %arg9[%c0_20, %c0_21] : memref<1x64xf32, #tpu.memory_space<vmem>>, vector<1x64xf32>
    %27 = vector.broadcast %26 : vector<1x64xf32> to vector<256x64xf32>
    %28 = arith.addf %25, %27 : vector<256x64xf32>
    %cst_22 = arith.constant 0.000000e+00 : f32
    %29 = vector.broadcast %cst_22 : f32 to vector<256x64xf32>
    %30 = arith.maximumf %28, %29 : vector<256x64xf32>
    %31 = arith.truncf %30 : vector<256x64xf32> to vector<256x64xbf16>
    %c0_23 = arith.constant 0 : index
    %c0_24 = arith.constant 0 : index
    %32 = vector.load %arg10[%c0_23, %c0_24] : memref<64x128xbf16, #tpu.memory_space<vmem>>, vector<64x128xbf16>
    %cst_25 = arith.constant dense<0.000000e+00> : vector<256x128xf32>
    %33 = tpu.matmul %31, %32, %cst_25 {dimension_numbers = #tpu.dot_dimension_numbers<[1], [0], [0], [1], [0, 0, 1, 1], [], []>} : vector<256x64xbf16>, vector<64x128xbf16>, vector<256x128xf32> -> vector<256x128xf32>
    %c0_26 = arith.constant 0 : index
    %c0_27 = arith.constant 0 : index
    %34 = vector.load %arg11[%c0_26, %c0_27] : memref<1x128xf32, #tpu.memory_space<vmem>>, vector<1x128xf32>
    %35 = vector.broadcast %34 : vector<1x128xf32> to vector<256x128xf32>
    %36 = arith.addf %33, %35 : vector<256x128xf32>
    %cst_28 = arith.constant 0.000000e+00 : f32
    %37 = vector.broadcast %cst_28 : f32 to vector<256x128xf32>
    %38 = arith.maximumf %36, %37 : vector<256x128xf32>
    %39 = arith.truncf %38 : vector<256x128xf32> to vector<256x128xbf16>
    %c0_29 = arith.constant 0 : index
    %c0_30 = arith.constant 0 : index
    %40 = vector.load %arg12[%c0_29, %c0_30] : memref<128x128xbf16, #tpu.memory_space<vmem>>, vector<128x128xbf16>
    %cst_31 = arith.constant dense<0.000000e+00> : vector<256x128xf32>
    %41 = tpu.matmul %39, %40, %cst_31 {dimension_numbers = #tpu.dot_dimension_numbers<[1], [0], [0], [1], [0, 0, 1, 1], [], []>} : vector<256x128xbf16>, vector<128x128xbf16>, vector<256x128xf32> -> vector<256x128xf32>
    %c0_32 = arith.constant 0 : index
    %c0_33 = arith.constant 0 : index
    %42 = vector.load %arg13[%c0_32, %c0_33] : memref<1x128xf32, #tpu.memory_space<vmem>>, vector<1x128xf32>
    %43 = vector.broadcast %42 : vector<1x128xf32> to vector<256x128xf32>
    %44 = arith.addf %41, %43 : vector<256x128xf32>
    %45 = arith.negf %44 : vector<256x128xf32>
    %46 = math.exp %45 : vector<256x128xf32>
    %cst_34 = arith.constant 1.000000e+00 : f32
    %47 = vector.broadcast %cst_34 : f32 to vector<256x128xf32>
    %48 = arith.addf %47, %46 : vector<256x128xf32>
    %49 = arith.divf %47, %48 : vector<256x128xf32>
    %c1_i32 = arith.constant 1 : i32
    %50 = tpu.dynamic_rotate %49 by %c1_i32 dim 1 : vector<256x128xf32>, i32 -> vector<256x128xf32>
    %51 = arith.mulf %50, %49 : vector<256x128xf32>
    %cst_35 = arith.constant 1.000000e+00 : f32
    %52 = vector.broadcast %cst_35 : f32 to vector<256x128xf32>
    %53 = arith.subf %52, %51 : vector<256x128xf32>
    %54 = arith.mulf %49, %53 : vector<256x128xf32>
    %c64_i32 = arith.constant 64 : i32
    %55 = tpu.dynamic_rotate %22 by %c64_i32 dim 1 : vector<256x128xf32>, i32 -> vector<256x128xf32>
    %56 = arith.addf %54, %55 : vector<256x128xf32>
    %c0_36 = arith.constant 0 : index
    %c0_37 = arith.constant 0 : index
    %57 = vector.load %arg14[%c0_36, %c0_37] : memref<256x128xf32, #tpu.memory_space<vmem>>, vector<256x128xf32>
    tpu.vector_store %arg14[%c0_36, %c0_37], %56 {strides = array<i32>} : memref<256x128xf32, #tpu.memory_space<vmem>>, vector<256x128xf32>,
    return
  }
  func.func @transform_0(%arg0: i32) -> (i32, i32) {
    %c0_i32 = arith.constant 0 : i32
    %c0_i32_0 = arith.constant 0 : i32
    return %arg0, %c0_i32 : i32, i32
  }
  func.func @transform_1(%arg0: i32) -> (i32, i32) {
    %c0_i32 = arith.constant 0 : i32
    %c0_i32_0 = arith.constant 0 : i32
    %c0_i32_1 = arith.constant 0 : i32
    return %c0_i32, %c0_i32_0 : i32, i32
  }
  func.func @transform_2(%arg0: i32) -> (i32, i32) {
    %c0_i32 = arith.constant 0 : i32
    %c0_i32_0 = arith.constant 0 : i32
    %c0_i32_1 = arith.constant 0 : i32
    return %c0_i32, %c0_i32_0 : i32, i32
  }
  func.func @transform_3(%arg0: i32) -> (i32, i32) {
    %c0_i32 = arith.constant 0 : i32
    %c0_i32_0 = arith.constant 0 : i32
    %c0_i32_1 = arith.constant 0 : i32
    return %c0_i32, %c0_i32_0 : i32, i32
  }
  func.func @transform_4(%arg0: i32) -> (i32, i32) {
    %c0_i32 = arith.constant 0 : i32
    %c0_i32_0 = arith.constant 0 : i32
    %c0_i32_1 = arith.constant 0 : i32
    return %c0_i32, %c0_i32_0 : i32, i32
  }
  func.func @transform_5(%arg0: i32) -> (i32, i32) {
    %c0_i32 = arith.constant 0 : i32
    %c0_i32_0 = arith.constant 0 : i32
    %c0_i32_1 = arith.constant 0 : i32
    return %c0_i32, %c0_i32_0 : i32, i32
  }
  func.func @transform_6(%arg0: i32) -> (i32, i32) {
    %c0_i32 = arith.constant 0 : i32
    %c0_i32_0 = arith.constant 0 : i32
    %c0_i32_1 = arith.constant 0 : i32
    return %c0_i32, %c0_i32_0 : i32, i32
  }
  func.func @transform_7(%arg0: i32) -> (i32, i32) {
    %c0_i32 = arith.constant 0 : i32
    %c0_i32_0 = arith.constant 0 : i32
    %c0_i32_1 = arith.constant 0 : i32
    return %c0_i32, %c0_i32_0 : i32, i32
  }
  func.func @transform_8(%arg0: i32) -> (i32, i32) {
    %c0_i32 = arith.constant 0 : i32
    %c0_i32_0 = arith.constant 0 : i32
    %c0_i32_1 = arith.constant 0 : i32
    return %c0_i32, %c0_i32_0 : i32, i32
  }
  func.func @transform_9(%arg0: i32) -> (i32, i32) {
    %c0_i32 = arith.constant 0 : i32
    %c0_i32_0 = arith.constant 0 : i32
    %c0_i32_1 = arith.constant 0 : i32
    return %c0_i32, %c0_i32_0 : i32, i32
  }
  func.func @transform_10(%arg0: i32) -> (i32, i32) {
    %c0_i32 = arith.constant 0 : i32
    %c0_i32_0 = arith.constant 0 : i32
    %c0_i32_1 = arith.constant 0 : i32
    return %c0_i32, %c0_i32_0 : i32, i32
  }
  func.func @transform_11(%arg0: i32) -> (i32, i32) {
    %c0_i32 = arith.constant 0 : i32
    %c0_i32_0 = arith.constant 0 : i32
    %c0_i32_1 = arith.constant 0 : i32
    return %c0_i32, %c0_i32_0 : i32, i32
  }
  func.func @transform_12(%arg0: i32) -> (i32, i32) {
    %c0_i32 = arith.constant 0 : i32
    %c0_i32_0 = arith.constant 0 : i32
    %c0_i32_1 = arith.constant 0 : i32
    return %c0_i32, %c0_i32_0 : i32, i32
  }
  func.func @transform_13(%arg0: i32) -> (i32, i32) {
    %c0_i32 = arith.constant 0 : i32
    %c0_i32_0 = arith.constant 0 : i32
    return %arg0, %c0_i32 : i32, i32
  }
}

</mosaic_0001>

<bundles_post_ra>
// kernel: neural_compressor_forward.1
= control target key start
LH: loop header
LB: loop body
LE: loop exit
PB: predicated region body
PF: predicated region fallthrough
CT: control target
= control target key end

     0   :  { %s3669_s25 = smov 0   ;;  %s4468_s0 = inlined_call_operand.vmem [shape: bf16[512,64], index: 0, kind: input, shape index: {}]   ;;  %s4469_s1 = inlined_call_operand.vmem [shape: bf16[64,128], index: 1, kind: input, shape index: {}]   ;;  %s4470_s2 = inlined_call_operand.vmem [shape: f32[1,128], index: 2, kind: input, shape index: {}]   ;;  %s4471_s3 = inlined_call_operand.vmem [shape: bf16[128,64], index: 3, kind: input, shape index: {}]   ;;  %s4472_s4 = inlined_call_operand.vmem [shape: f32[1,64], index: 4, kind: input, shape index: {}]   ;;  %s4473_s5 = inlined_call_operand.vmem [shape: bf16[64,128], index: 5, kind: input, shape index: {}]   ;;  %s4474_s6 = inlined_call_operand.vmem [shape: f32[1,128], index: 6, kind: input, shape index: {}]   ;;  %s4475_s7 = inlined_call_operand.vmem [shape: bf16[128,64], index: 7, kind: input, shape index: {}]   ;;  %s4476_s8 = inlined_call_operand.vmem [shape: f32[1,64], index: 8, kind: input, shape index: {}]   ;;  %s4477_s9 = inlined_call_operand.vmem [shape: bf16[64,128], index: 9, kind: input, shape index: {}]   ;;  %s4478_s10 = inlined_call_operand.vmem [shape: f32[1,128], index: 10, kind: input, shape index: {}]   ;;  %s4479_s11 = inlined_call_operand.vmem [shape: bf16[128,128], index: 11, kind: input, shape index: {}]   ;;  %s4480_s12 = inlined_call_operand.vmem [shape: f32[1,128], index: 12, kind: input, shape index: {}]   ;;  %s4481_s13 = inlined_call_operand.vmem [shape: f32[512,128], index: 13, kind: output, shape index: {}]  }
   0x1 LB: > { %s2774_s26 = sadd.s32 4294967295, %s3595_s25   ;;  %p2778_p0 = scmp.ge.s32.totalorder %s3595_s25, 1  ;;  %s3595_s25 = sphi %s3669_s25, %s23_s25  }
   0x2   : > { %p388_p1 = scmp.lt.s32.totalorder %s3595_s25, 3 }
   0x4   : > { %p389_p2 = pnand %p2778_p0, %p388_p1 }
   0x6   : > { %392 = sbr.rel (%p389_p2) target bundleno = 1489 (0x5d1), region = 72 }
   0xb   : > { %v3345_v0 = vld [vmem:[%s4469_s1 + $0x18] sm:$0xff]   ;;  %s2779_s29 = sshll.u32 %s2774_s26, 5  ;;  %v3346_v1 = vld [vmem:[%s4469_s1 + $0x10] sm:$0xff]   ;;  %v3347_v2 = vld [vmem:[%s4469_s1 + $0x8] sm:$0xff]   ;;  %vm596_vm0 = vcmask 523264   ;;  %s3597_s24 = smov 64  }
   0xc   : > { %p433_p3 = scmp.lt.s32.totalorder %s2779_s29, 63  ;;  %3055 = vmatprep.subr.bf16.mxu0 %v3345_v0  ;;  %v3365_v3 = vld [vmem:[%s4471_s3 + $0x38] sm:$0xff]   ;;  %v3366_v4 = vld [vmem:[%s4471_s3 + $0x30] sm:$0xff]   ;;  %v3348_v5 = vld [vmem:[%s4469_s1] sm:$0xff]   ;;  %s3598_s28 = smov 1  }
   0xd   : > { %3056 = vmatpush3.bf16.msra.mxu0 %v3345_v0  ;;  %3095 = vmatprep.subr.bf16.mxu1 %v3365_v3  ;;  %v3367_v7 = vld [vmem:[%s4471_s3 + $0x28] sm:$0xff]   ;;  %v3368_v12 = vld [vmem:[%s4471_s3 + $0x20] sm:$0xff]   ;;  %v3369_v13 = vld [vmem:[%s4471_s3 + $0x18] sm:$0xff]  }
   0xe   : > { %s4511_s29 = smov (!%p433_p3, %s2779_s29), 63  ;;  %3057 = vmatprep.subr.bf16.mxu0 %v3346_v1  ;;  %3096 = vmatpush3.bf16.msra.mxu1 %v3365_v3  ;;  %v3370_v25 = vld [vmem:[%s4471_s3 + $0x10] sm:$0xff]   ;;  %v3371_v26 = vld [vmem:[%s4471_s3 + $0x8] sm:$0xff]   ;;  %v3372_v27 = vld [vmem:[%s4471_s3] sm:$0xff]  }
   0xf   : > { %s2780_s19 = sshll.u32 %s4511_s29, 2  ;;  %3097 = vmatprep.subr.bf16.mxu1 %v3366_v4  ;;  %v3373_v28 = vld [vmem:[%s4473_s5 + $0x18] sm:$0xff]   ;;  %v3374_v29 = vld [vmem:[%s4473_s5 + $0x10] sm:$0xff]   ;;  %v3375_v30 = vld [vmem:[%s4473_s5 + $0x8] sm:$0xff]  }
  0x10   : > { %s3701_s27 = scalar_lea.vmem %s4468_s0, %s2780_s19  ;;  %v3376_v31 = vld [vmem:[%s4473_s5] sm:$0xff]  }
  0x11   : > { %3058 = vmatpush3.bf16.msra.mxu0 %v3346_v1  ;;  %v3349_v6 = vld [vmem:[%s3701_s27] sm:$0xff]   ;;  %v3350_v8 = vld [vmem:[%s3701_s27 + $0x8] sm:$0xff]   ;;  %v3351_v9 = vld [vmem:[%s3701_s27 + $0x10] sm:$0xff]  }
  0x12   : > { %3059 = vmatprep.subr.bf16.mxu0 %v3347_v2  ;;  %3063 = vmatprep.mubr.msk.bf16.mxu0 %vm596_vm0, %v3349_v6  ;;  %v3352_v10 = vld [vmem:[%s3701_s27 + $0x18] sm:$0xff]   ;;  %v3353_v11 = vld [vmem:[%s3701_s27 + $0x20] sm:$0xff]   ;;  %v3354_v14 = vld [vmem:[%s3701_s27 + $0x28] sm:$0xff]  }
  0x13   : > { %3098 = vmatpush3.bf16.msra.mxu1 %v3366_v4  ;;  %v3355_v15 = vld [vmem:[%s3701_s27 + $0x30] sm:$0xff]   ;;  %v3356_v16 = vld [vmem:[%s3701_s27 + $0x38] sm:$0xff]   ;;  %v3357_v17 = vld [vmem:[%s3701_s27 + $0x40] sm:$0xff]  }
  0x14   : > { %3099 = vmatprep.subr.bf16.mxu1 %v3367_v7  ;;  %v3358_v18 = vld [vmem:[%s3701_s27 + $0x48] sm:$0xff]   ;;  %v3359_v19 = vld [vmem:[%s3701_s27 + $0x50] sm:$0xff]   ;;  %v3360_v20 = vld [vmem:[%s3701_s27 + $0x58] sm:$0xff]  }
  0x15   : > { %3060 = vmatpush3.bf16.msra.mxu0 %v3347_v2  ;;  %v3361_v21 = vld [vmem:[%s3701_s27 + $0x60] sm:$0xff]   ;;  %v3362_v22 = vld [vmem:[%s3701_s27 + $0x68] sm:$0xff]   ;;  %v3363_v23 = vld [vmem:[%s3701_s27 + $0x70] sm:$0xff]  }
  0x16   : > { %3061 = vmatprep.subr.bf16.mxu0 %v3348_v5  ;;  %v3364_v24 = vld [vmem:[%s3701_s27 + $0x78] sm:$0xff]   ;;  %v3768_v34 = vld [vmem:[%s4470_s2] ss:$0 sm:$0xff] }
  0x17   : > { %3100 = vmatpush3.bf16.msra.mxu1 %v3367_v7 }
  0x18   : > { %3101 = vmatprep.subr.bf16.mxu1 %v3368_v12 }
  0x19   : > { %3062 = vmatpush3.bf16.msra.mxu0 %v3348_v5 }
  0x1a   : > { %3143 = vmatprep.subr.bf16.mxu0 %v3373_v28 }
  0x1b   : > { %3102 = vmatpush3.bf16.msra.mxu1 %v3368_v12 }
  0x1c   : > { %3064 = vmatmul.mubr.msk.bf16.vlgmr.msra.gmra.mxu0 %vm596_vm0, %v3350_v8  ;;  %3103 = vmatprep.subr.bf16.mxu1 %v3369_v13 }
  0x1d   : > { %3067 = vmatprep.mubr.msk.bf16.mxu0 %vm596_vm0, %v3351_v9  ;;  %3144 = vmatpush3.bf16.msra.mxu0 %v3373_v28 }
  0x1e   : > { %3145 = vmatprep.subr.bf16.mxu0 %v3374_v29 }
  0x1f   : > { %3104 = vmatpush3.bf16.msra.mxu1 %v3369_v13 }
  0x20   : > { %3105 = vmatprep.subr.bf16.mxu1 %v3370_v25 }
  0x21   : > { %3146 = vmatpush3.bf16.msra.mxu0 %v3374_v29 }
  0x22   : > { %3147 = vmatprep.subr.bf16.mxu0 %v3375_v30 }
  0x23   : > { %3106 = vmatpush3.bf16.msra.mxu1 %v3370_v25 }
  0x24   : > { %3068 = vmatmul.mubr.msk.bf16.gmra.mxu0 %vm596_vm0, %v3352_v10  ;;  %3107 = vmatprep.subr.bf16.mxu1 %v3371_v26 }
  0x25   : > { %3071 = vmatprep.mubr.msk.bf16.mxu0 %vm596_vm0, %v3353_v11  ;;  %3148 = vmatpush3.bf16.msra.mxu0 %v3375_v30 }
  0x26   : > { %3149 = vmatprep.subr.bf16.mxu0 %v3376_v31 }
  0x27   : > { %3108 = vmatpush3.bf16.msra.mxu1 %v3371_v26 }
  0x28   : > { %3109 = vmatprep.subr.bf16.mxu1 %v3372_v27 }
  0x29   : > { %3150 = vmatpush3.bf16.msra.mxu0 %v3376_v31 }
  0x2b   : > { %3110 = vmatpush3.bf16.msra.mxu1 %v3372_v27 }
  0x2c   : > { %3072 = vmatmul.mubr.msk.bf16.gmra.mxu0 %vm596_vm0, %v3354_v14 }
  0x2d   : > { %3075 = vmatprep.mubr.msk.bf16.mxu0 %vm596_vm0, %v3355_v15 }
  0x34   : > { %3076 = vmatmul.mubr.msk.bf16.gmra.mxu0 %vm596_vm0, %v3356_v16 }
  0x35   : > { %3079 = vmatprep.mubr.msk.bf16.mxu0 %vm596_vm0, %v3357_v17 }
  0x3c   : > { %3080 = vmatmul.mubr.msk.bf16.gmra.mxu0 %vm596_vm0, %v3358_v18 }
  0x3d   : > { %3083 = vmatprep.mubr.msk.bf16.mxu0 %vm596_vm0, %v3359_v19 }
  0x44   : > { %3084 = vmatmul.mubr.msk.bf16.gmra.mxu0 %vm596_vm0, %v3360_v20 }
  0x45   : > { %3087 = vmatprep.mubr.msk.bf16.mxu0 %vm596_vm0, %v3361_v21 }
  0x4c   : > { %3088 = vmatmul.mubr.msk.bf16.gmra.mxu0 %vm596_vm0, %v3362_v22 }
  0x4d   : > { %3091 = vmatprep.mubr.msk.bf16.mxu0 %vm596_vm0, %v3363_v23 }
  0x54   : > { %3092 = vmatmul.mubr.msk.bf16.gmra.mxu0 %vm596_vm0, %v3364_v24 }
  0xdc   : > { %v3065_v32 = vpop.f32.mrf.mxu0 }
  0xdd   : > { %v688_v38 = vadd.f32 %v3065_v32, %v3768_v34 }
  0xde   : > { %v679_v33 = vpop.f32.mrf.mxu0 }
  0xdf   : > { %v680_v36 = vadd.f32 %v3768_v34, %v679_v33  ;;  %v808_v45 = vmax.f32 %v688_v38, 0.0 }
  0xe0   : > { %v3066_v35 = vpop.f32.mrf.mxu0 }
  0xe1   : > { %v691_v37 = vadd.f32 %v3066_v35, %v3768_v34  ;;  %v806_v43 = vmax.f32 %v680_v36, 0.0 }
  0xe2   : > { %v682_v39 = vpop.f32.mrf.mxu0 }
  0xe3   : > { %v683_v40 = vadd.f32 %v3768_v34, %v682_v39  ;;  %v809_v41 = vmax.f32 %v691_v37, 0.0 }
  0xe4   : > { %v3069_v42 = vpop.f32.mrf.mxu0 }
  0xe5   : > { %v807_v44 = vmax.f32 %v683_v40, 0.0  ;;  %v839_v48 = vpack.c.bf16 %v809_v41, %v808_v45  ;;  %v704_v52 = vadd.f32 %v3069_v42, %v3768_v34 }
  0xe6   : > { %v695_v46 = vpop.f32.mrf.mxu0 }
  0xe7   : > { %v838_v47 = vpack.c.bf16 %v807_v44, %v806_v43  ;;  %v696_v50 = vadd.f32 %v3768_v34, %v695_v46  ;;  %v812_v59 = vmax.f32 %v704_v52, 0.0 }
  0xe8   : > { %v3070_v49 = vpop.f32.mrf.mxu0 }
  0xe9   : > { %v707_v51 = vadd.f32 %v3070_v49, %v3768_v34  ;;  %3111 = vmatprep.mubr.bf16.mxu1 %v838_v47  ;;  %v810_v57 = vmax.f32 %v696_v50, 0.0 }
  0xea   : > { %v698_v53 = vpop.f32.mrf.mxu0  ;;  %3112 = vmatmul.mubr.bf16.vlgmr.msra.gmra.mxu1 %v839_v48 }
  0xeb   : > { %v699_v54 = vadd.f32 %v3768_v34, %v698_v53  ;;  %v813_v55 = vmax.f32 %v707_v51, 0.0 }
  0xec   : > { %v3073_v56 = vpop.f32.mrf.mxu0 }
  0xed   : > { %v811_v58 = vmax.f32 %v699_v54, 0.0  ;;  %v841_v62 = vpack.c.bf16 %v813_v55, %v812_v59  ;;  %v720_v2 = vadd.f32 %v3073_v56, %v3768_v34 }
  0xee   : > { %v711_v60 = vpop.f32.mrf.mxu0 }
  0xef   : > { %v840_v61 = vpack.c.bf16 %v811_v58, %v810_v57  ;;  %v712_v0 = vadd.f32 %v3768_v34, %v711_v60  ;;  %v816_v9 = vmax.f32 %v720_v2, 0.0 }
  0xf0   : > { %v3074_v63 = vpop.f32.mrf.mxu0 }
  0xf1   : > { %v723_v1 = vadd.f32 %v3074_v63, %v3768_v34  ;;  %3115 = vmatprep.mubr.bf16.mxu1 %v840_v61  ;;  %v814_v7 = vmax.f32 %v712_v0, 0.0 }
  0xf2   : > { %v714_v3 = vpop.f32.mrf.mxu0  ;;  %3116 = vmatmul.mubr.bf16.gmra.mxu1 %v841_v62 }
  0xf3   : > { %v715_v4 = vadd.f32 %v3768_v34, %v714_v3  ;;  %v817_v5 = vmax.f32 %v723_v1, 0.0 }
  0xf4   : > { %v3077_v6 = vpop.f32.mrf.mxu0 }
  0xf5   : > { %v815_v8 = vmax.f32 %v715_v4, 0.0  ;;  %v843_v12 = vpack.c.bf16 %v817_v5, %v816_v9  ;;  %v736_v16 = vadd.f32 %v3077_v6, %v3768_v34 }
  0xf6   : > { %v727_v10 = vpop.f32.mrf.mxu0 }
  0xf7   : > { %v842_v11 = vpack.c.bf16 %v815_v8, %v814_v7  ;;  %v728_v14 = vadd.f32 %v3768_v34, %v727_v10  ;;  %v820_v23 = vmax.f32 %v736_v16, 0.0 }
  0xf8   : > { %v3078_v13 = vpop.f32.mrf.mxu0 }
  0xf9   : > { %v739_v15 = vadd.f32 %v3078_v13, %v3768_v34  ;;  %3119 = vmatprep.mubr.bf16.mxu1 %v842_v11  ;;  %v818_v21 = vmax.f32 %v728_v14, 0.0 }
  0xfa   : > { %v730_v17 = vpop.f32.mrf.mxu0  ;;  %3120 = vmatmul.mubr.bf16.gmra.mxu1 %v843_v12 }
  0xfb   : > { %v731_v18 = vadd.f32 %v3768_v34, %v730_v17  ;;  %v821_v19 = vmax.f32 %v739_v15, 0.0 }
  0xfc   : > { %v3081_v20 = vpop.f32.mrf.mxu0 }
  0xfd   : > { %v819_v22 = vmax.f32 %v731_v18, 0.0  ;;  %v845_v26 = vpack.c.bf16 %v821_v19, %v820_v23  ;;  %v752_v30 = vadd.f32 %v3081_v20, %v3768_v34  ;;  %v3377_v18 = vld [vmem:[%s4475_s7 + $0x38] sm:$0xff]   ;;  %v3378_v19 = vld [vmem:[%s4475_s7 + $0x30] sm:$0xff]   ;;  %v3380_v20 = vld [vmem:[%s4475_s7 + $0x20] sm:$0xff]  }
  0xfe   : > { %v743_v24 = vpop.f32.mrf.mxu0  ;;  %3183 = vmatprep.subr.bf16.mxu1 %v3377_v18 }
  0xff   : > { %v844_v25 = vpack.c.bf16 %v819_v22, %v818_v21  ;;  %v744_v28 = vadd.f32 %v3768_v34, %v743_v24  ;;  %v824_v38 = vmax.f32 %v752_v30, 0.0  ;;  %3184 = vmatpush3.bf16.msra.mxu1 %v3377_v18  ;;  %v3381_v21 = vld [vmem:[%s4475_s7 + $0x18] sm:$0xff]   ;;  %v3820_v24 = vld [vmem:[%s4472_s4] ss:$0 sm:$0xff] }
 0x100   : > { %v3082_v27 = vpop.f32.mrf.mxu0  ;;  %3185 = vmatprep.subr.bf16.mxu1 %v3378_v19 }
 0x101   : > { %v755_v29 = vadd.f32 %v3082_v27, %v3768_v34  ;;  %3123 = vmatprep.mubr.bf16.mxu1 %v844_v25  ;;  %v822_v36 = vmax.f32 %v744_v28, 0.0 }
 0x102   : > { %v746_v31 = vpop.f32.mrf.mxu0  ;;  %3124 = vmatmul.mubr.bf16.gmra.mxu1 %v845_v26 }
 0x103   : > { %v747_v32 = vadd.f32 %v3768_v34, %v746_v31  ;;  %v825_v33 = vmax.f32 %v755_v29, 0.0  ;;  %3186 = vmatpush3.bf16.msra.mxu1 %v3378_v19 }
 0x104   : > { %v3085_v35 = vpop.f32.mrf.mxu0 }
 0x105   : > { %v823_v37 = vmax.f32 %v747_v32, 0.0  ;;  %v847_v41 = vpack.c.bf16 %v825_v33, %v824_v38  ;;  %v768_v45 = vadd.f32 %v3085_v35, %v3768_v34 }
 0x106   : > { %v759_v39 = vpop.f32.mrf.mxu0 }
 0x107   : > { %v846_v40 = vpack.c.bf16 %v823_v37, %v822_v36  ;;  %v760_v43 = vadd.f32 %v3768_v34, %v759_v39  ;;  %v828_v52 = vmax.f32 %v768_v45, 0.0 }
 0x108   : > { %v3086_v42 = vpop.f32.mrf.mxu0 }
 0x109   : > { %v771_v44 = vadd.f32 %v3086_v42, %v3768_v34  ;;  %3127 = vmatprep.mubr.bf16.mxu1 %v846_v40  ;;  %v826_v50 = vmax.f32 %v760_v43, 0.0 }
 0x10a   : > { %v762_v46 = vpop.f32.mrf.mxu0  ;;  %3128 = vmatmul.mubr.bf16.gmra.mxu1 %v847_v41 }
 0x10b   : > { %v763_v47 = vadd.f32 %v3768_v34, %v762_v46  ;;  %v829_v48 = vmax.f32 %v771_v44, 0.0 }
 0x10c   : > { %v3089_v49 = vpop.f32.mrf.mxu0 }
 0x10d   : > { %v827_v51 = vmax.f32 %v763_v47, 0.0  ;;  %v849_v55 = vpack.c.bf16 %v829_v48, %v828_v52  ;;  %v784_v59 = vadd.f32 %v3089_v49, %v3768_v34 }
 0x10e   : > { %v775_v53 = vpop.f32.mrf.mxu0 }
 0x10f   : > { %v848_v54 = vpack.c.bf16 %v827_v51, %v826_v50  ;;  %v776_v57 = vadd.f32 %v3768_v34, %v775_v53  ;;  %v832_v2 = vmax.f32 %v784_v59, 0.0 }
 0x110   : > { %v3090_v56 = vpop.f32.mrf.mxu0 }
 0x111   : > { %v787_v58 = vadd.f32 %v3090_v56, %v3768_v34  ;;  %3131 = vmatprep.mubr.bf16.mxu1 %v848_v54  ;;  %v830_v0 = vmax.f32 %v776_v57, 0.0 }
 0x112   : > { %v778_v60 = vpop.f32.mrf.mxu0  ;;  %3132 = vmatmul.mubr.bf16.gmra.mxu1 %v849_v55 }
 0x113   : > { %v779_v61 = vadd.f32 %v3768_v34, %v778_v60  ;;  %v833_v62 = vmax.f32 %v787_v58, 0.0 }
 0x114   : > { %v3093_v63 = vpop.f32.mrf.mxu0 }
 0x115   : > { %v831_v1 = vmax.f32 %v779_v61, 0.0  ;;  %v851_v5 = vpack.c.bf16 %v833_v62, %v832_v2  ;;  %v800_v9 = vadd.f32 %v3093_v63, %v3768_v34 }
 0x116   : > { %v791_v3 = vpop.f32.mrf.mxu0 }
 0x117   : > { %v850_v4 = vpack.c.bf16 %v831_v1, %v830_v0  ;;  %v792_v7 = vadd.f32 %v3768_v34, %v791_v3  ;;  %v836_v15 = vmax.f32 %v800_v9, 0.0 }
 0x118   : > { %v3094_v6 = vpop.f32.mrf.mxu0 }
 0x119   : > { %v803_v8 = vadd.f32 %v3094_v6, %v3768_v34  ;;  %3135 = vmatprep.mubr.bf16.mxu1 %v850_v4  ;;  %v834_v13 = vmax.f32 %v792_v7, 0.0 }
 0x11a   : > { %v794_v10 = vpop.f32.mrf.mxu0  ;;  %3136 = vmatmul.mubr.bf16.gmra.mxu1 %v851_v5 }
 0x11b   : > { %v795_v11 = vadd.f32 %v3768_v34, %v794_v10  ;;  %v837_v12 = vmax.f32 %v803_v8, 0.0  ;;  %v3379_v34 = vld [vmem:[%s4475_s7 + $0x28] sm:$0xff]  }
 0x11c   : > { %3187 = vmatprep.subr.bf16.mxu1 %v3379_v34 }
 0x11d   : > { %v835_v14 = vmax.f32 %v795_v11, 0.0  ;;  %v853_v17 = vpack.c.bf16 %v837_v12, %v836_v15  ;;  %3188 = vmatpush3.bf16.msra.mxu1 %v3379_v34 }
 0x11e   : > { %3189 = vmatprep.subr.bf16.mxu1 %v3380_v20 }
 0x11f   : > { %v852_v16 = vpack.c.bf16 %v835_v14, %v834_v13 }
 0x121   : > { %3139 = vmatprep.mubr.bf16.mxu1 %v852_v16  ;;  %3190 = vmatpush3.bf16.msra.mxu1 %v3380_v20 }
 0x122   : > { %3140 = vmatmul.mubr.bf16.gmra.mxu1 %v853_v17  ;;  %3191 = vmatprep.subr.bf16.mxu1 %v3381_v21 }
 0x125   : > { %3192 = vmatpush3.bf16.msra.mxu1 %v3381_v21 }
 0x1aa   : > { %v3113_v22 = vpop.f32.mrf.mxu1 }
 0x1ab   : > { %v968_v28 = vadd.f32 %v3113_v22, %v3820_v24 }
 0x1ac   : > { %v959_v23 = vpop.f32.mrf.mxu1 }
 0x1ad   : > { %v960_v26 = vadd.f32 %v3820_v24, %v959_v23  ;;  %v1088_v36 = vmax.f32 %v968_v28, 0.0 }
 0x1ae   : > { %v3114_v25 = vpop.f32.mrf.mxu1 }
 0x1af   : > { %v971_v27 = vadd.f32 %v3114_v25, %v3820_v24  ;;  %v1086_v33 = vmax.f32 %v960_v26, 0.0 }
 0x1b0   : > { %v962_v29 = vpop.f32.mrf.mxu1 }
 0x1b1   : > { %v963_v30 = vadd.f32 %v3820_v24, %v962_v29  ;;  %v1089_v31 = vmax.f32 %v971_v27, 0.0 }
 0x1b2   : > { %v3117_v32 = vpop.f32.mrf.mxu1 }
 0x1b3   : > { %v1087_v35 = vmax.f32 %v963_v30, 0.0  ;;  %v1119_v39 = vpack.c.bf16 %v1089_v31, %v1088_v36  ;;  %v984_v43 = vadd.f32 %v3117_v32, %v3820_v24 }
 0x1b4   : > { %v975_v37 = vpop.f32.mrf.mxu1 }
 0x1b5   : > { %v1118_v38 = vpack.c.bf16 %v1087_v35, %v1086_v33  ;;  %v976_v41 = vadd.f32 %v3820_v24, %v975_v37  ;;  %v1092_v50 = vmax.f32 %v984_v43, 0.0 }
 0x1b6   : > { %v3118_v40 = vpop.f32.mrf.mxu1 }
 0x1b7   : > { %v987_v42 = vadd.f32 %v3118_v40, %v3820_v24  ;;  %3151 = vmatprep.mubr.msk.bf16.mxu0 %vm596_vm0, %v1118_v38  ;;  %v1090_v48 = vmax.f32 %v976_v41, 0.0 }
 0x1b8   : > { %v978_v44 = vpop.f32.mrf.mxu1  ;;  %3152 = vmatmul.mubr.msk.bf16.vlgmr.msra.gmra.mxu0 %vm596_vm0, %v1119_v39 }
 0x1b9   : > { %v979_v45 = vadd.f32 %v3820_v24, %v978_v44  ;;  %v1093_v46 = vmax.f32 %v987_v42, 0.0 }
 0x1ba   : > { %v3121_v47 = vpop.f32.mrf.mxu1 }
 0x1bb   : > { %v1091_v49 = vmax.f32 %v979_v45, 0.0  ;;  %v1121_v53 = vpack.c.bf16 %v1093_v46, %v1092_v50  ;;  %v1000_v57 = vadd.f32 %v3121_v47, %v3820_v24 }
 0x1bc   : > { %v991_v51 = vpop.f32.mrf.mxu1 }
 0x1bd   : > { %v1120_v52 = vpack.c.bf16 %v1091_v49, %v1090_v48  ;;  %v992_v55 = vadd.f32 %v3820_v24, %v991_v51  ;;  %v1096_v0 = vmax.f32 %v1000_v57, 0.0 }
 0x1be   : > { %v3122_v54 = vpop.f32.mrf.mxu1 }
 0x1bf   : > { %v1003_v56 = vadd.f32 %v3122_v54, %v3820_v24  ;;  %3155 = vmatprep.mubr.msk.bf16.mxu0 %vm596_vm0, %v1120_v52  ;;  %v1094_v62 = vmax.f32 %v992_v55, 0.0 }
 0x1c0   : > { %v994_v58 = vpop.f32.mrf.mxu1  ;;  %3156 = vmatmul.mubr.msk.bf16.gmra.mxu0 %vm596_vm0, %v1121_v53 }
 0x1c1   : > { %v995_v59 = vadd.f32 %v3820_v24, %v994_v58  ;;  %v1097_v60 = vmax.f32 %v1003_v56, 0.0 }
 0x1c2   : > { %v3125_v61 = vpop.f32.mrf.mxu1 }
 0x1c3   : > { %v1095_v63 = vmax.f32 %v995_v59, 0.0  ;;  %v1123_v3 = vpack.c.bf16 %v1097_v60, %v1096_v0  ;;  %v1016_v7 = vadd.f32 %v3125_v61, %v3820_v24 }
 0x1c4   : > { %v1007_v1 = vpop.f32.mrf.mxu1 }
 0x1c5   : > { %v1122_v2 = vpack.c.bf16 %v1095_v63, %v1094_v62  ;;  %v1008_v5 = vadd.f32 %v3820_v24, %v1007_v1  ;;  %v1100_v14 = vmax.f32 %v1016_v7, 0.0 }
 0x1c6   : > { %v3126_v4 = vpop.f32.mrf.mxu1 }
 0x1c7   : > { %v1019_v6 = vadd.f32 %v3126_v4, %v3820_v24  ;;  %3159 = vmatprep.mubr.msk.bf16.mxu0 %vm596_vm0, %v1122_v2  ;;  %v1098_v12 = vmax.f32 %v1008_v5, 0.0 }
 0x1c8   : > { %v1010_v8 = vpop.f32.mrf.mxu1  ;;  %3160 = vmatmul.mubr.msk.bf16.gmra.mxu0 %vm596_vm0, %v1123_v3 }
 0x1c9   : > { %v1011_v9 = vadd.f32 %v3820_v24, %v1010_v8  ;;  %v1101_v10 = vmax.f32 %v1019_v6, 0.0 }
 0x1ca   : > { %v3129_v11 = vpop.f32.mrf.mxu1 }
 0x1cb   : > { %v1099_v13 = vmax.f32 %v1011_v9, 0.0  ;;  %v1125_v17 = vpack.c.bf16 %v1101_v10, %v1100_v14  ;;  %v1032_v20 = vadd.f32 %v3129_v11, %v3820_v24  ;;  %v3382_v9 = vld [vmem:[%s4475_s7 + $0x10] sm:$0xff]   ;;  %v3384_v10 = vld [vmem:[%s4475_s7] sm:$0xff]  }
 0x1cc   : > { %v1023_v15 = vpop.f32.mrf.mxu1  ;;  %3193 = vmatprep.subr.bf16.mxu1 %v3382_v9  ;;  %v3882_v11 = vld [vmem:[%s4474_s6] ss:$0 sm:$0xff] }
 0x1cd   : > { %v1124_v16 = vpack.c.bf16 %v1099_v13, %v1098_v12  ;;  %v1024_v19 = vadd.f32 %v3820_v24, %v1023_v15  ;;  %v1104_v28 = vmax.f32 %v1032_v20, 0.0  ;;  %3194 = vmatpush3.bf16.msra.mxu1 %v3382_v9 }
 0x1ce   : > { %v3130_v18 = vpop.f32.mrf.mxu1 }
 0x1cf   : > { %v1035_v34 = vadd.f32 %v3130_v18, %v3820_v24  ;;  %3163 = vmatprep.mubr.msk.bf16.mxu0 %vm596_vm0, %v1124_v16  ;;  %v1102_v26 = vmax.f32 %v1024_v19, 0.0 }
 0x1d0   : > { %v1026_v21 = vpop.f32.mrf.mxu1  ;;  %3164 = vmatmul.mubr.msk.bf16.gmra.mxu0 %vm596_vm0, %v1125_v17 }
 0x1d1   : > { %v1027_v22 = vadd.f32 %v3820_v24, %v1026_v21  ;;  %v1105_v23 = vmax.f32 %v1035_v34, 0.0 }
 0x1d2   : > { %v3133_v25 = vpop.f32.mrf.mxu1 }
 0x1d3   : > { %v1103_v27 = vmax.f32 %v1027_v22, 0.0  ;;  %v1127_v31 = vpack.c.bf16 %v1105_v23, %v1104_v28  ;;  %v1048_v36 = vadd.f32 %v3133_v25, %v3820_v24 }
 0x1d4   : > { %v1039_v29 = vpop.f32.mrf.mxu1 }
 0x1d5   : > { %v1126_v30 = vpack.c.bf16 %v1103_v27, %v1102_v26  ;;  %v1040_v33 = vadd.f32 %v3820_v24, %v1039_v29  ;;  %v1108_v43 = vmax.f32 %v1048_v36, 0.0 }
 0x1d6   : > { %v3134_v32 = vpop.f32.mrf.mxu1 }
 0x1d7   : > { %v1051_v35 = vadd.f32 %v3134_v32, %v3820_v24  ;;  %3167 = vmatprep.mubr.msk.bf16.mxu0 %vm596_vm0, %v1126_v30  ;;  %v1106_v41 = vmax.f32 %v1040_v33, 0.0 }
 0x1d8   : > { %v1042_v37 = vpop.f32.mrf.mxu1  ;;  %3168 = vmatmul.mubr.msk.bf16.gmra.mxu0 %vm596_vm0, %v1127_v31 }
 0x1d9   : > { %v1043_v38 = vadd.f32 %v3820_v24, %v1042_v37  ;;  %v1109_v39 = vmax.f32 %v1051_v35, 0.0 }
 0x1da   : > { %v3137_v40 = vpop.f32.mrf.mxu1 }
 0x1db   : > { %v1107_v42 = vmax.f32 %v1043_v38, 0.0  ;;  %v1129_v46 = vpack.c.bf16 %v1109_v39, %v1108_v43  ;;  %v1064_v50 = vadd.f32 %v3137_v40, %v3820_v24 }
 0x1dc   : > { %v1055_v44 = vpop.f32.mrf.mxu1 }
 0x1dd   : > { %v1128_v45 = vpack.c.bf16 %v1107_v42, %v1106_v41  ;;  %v1056_v48 = vadd.f32 %v3820_v24, %v1055_v44  ;;  %v1112_v57 = vmax.f32 %v1064_v50, 0.0 }
 0x1de   : > { %v3138_v47 = vpop.f32.mrf.mxu1 }
 0x1df   : > { %v1067_v49 = vadd.f32 %v3138_v47, %v3820_v24  ;;  %3171 = vmatprep.mubr.msk.bf16.mxu0 %vm596_vm0, %v1128_v45  ;;  %v1110_v55 = vmax.f32 %v1056_v48, 0.0 }
 0x1e0   : > { %v1058_v51 = vpop.f32.mrf.mxu1  ;;  %3172 = vmatmul.mubr.msk.bf16.gmra.mxu0 %vm596_vm0, %v1129_v46 }
 0x1e1   : > { %v1059_v52 = vadd.f32 %v3820_v24, %v1058_v51  ;;  %v1113_v53 = vmax.f32 %v1067_v49, 0.0 }
 0x1e2   : > { %v3141_v54 = vpop.f32.mrf.mxu1 }
 0x1e3   : > { %v1111_v56 = vmax.f32 %v1059_v52, 0.0  ;;  %v1131_v60 = vpack.c.bf16 %v1113_v53, %v1112_v57  ;;  %v1080_v0 = vadd.f32 %v3141_v54, %v3820_v24 }
 0x1e4   : > { %v1071_v58 = vpop.f32.mrf.mxu1 }
 0x1e5   : > { %v1130_v59 = vpack.c.bf16 %v1111_v56, %v1110_v55  ;;  %v1072_v62 = vadd.f32 %v3820_v24, %v1071_v58  ;;  %v1116_v6 = vmax.f32 %v1080_v0, 0.0 }
 0x1e6   : > { %v3142_v61 = vpop.f32.mrf.mxu1 }
 0x1e7   : > { %v1083_v63 = vadd.f32 %v3142_v61, %v3820_v24  ;;  %3175 = vmatprep.mubr.msk.bf16.mxu0 %vm596_vm0, %v1130_v59  ;;  %v1114_v4 = vmax.f32 %v1072_v62, 0.0 }
 0x1e8   : > { %v1074_v1 = vpop.f32.mrf.mxu1  ;;  %3176 = vmatmul.mubr.msk.bf16.gmra.mxu0 %vm596_vm0, %v1131_v60 }
 0x1e9   : > { %v1075_v2 = vadd.f32 %v3820_v24, %v1074_v1  ;;  %v1117_v3 = vmax.f32 %v1083_v63, 0.0  ;;  %v3383_v24 = vld [vmem:[%s4475_s7 + $0x8] sm:$0xff]   ;;  %v3385_v63 = vld [vmem:[%s4477_s9 + $0x18] sm:$0xff]  }
 0x1ea   : > { %3195 = vmatprep.subr.bf16.mxu1 %v3383_v24  ;;  %3231 = vmatprep.subr.bf16.mxu0 %v3385_v63 }
 0x1eb   : > { %v1115_v5 = vmax.f32 %v1075_v2, 0.0  ;;  %v1133_v8 = vpack.c.bf16 %v1117_v3, %v1116_v6  ;;  %3196 = vmatpush3.bf16.msra.mxu1 %v3383_v24  ;;  %3232 = vmatpush3.bf16.msra.mxu0 %v3385_v63 }
 0x1ec   : > { %3197 = vmatprep.subr.bf16.mxu1 %v3384_v10 }
 0x1ed   : > { %v1132_v7 = vpack.c.bf16 %v1115_v5, %v1114_v4 }
 0x1ef   : > { %3179 = vmatprep.mubr.msk.bf16.mxu0 %vm596_vm0, %v1132_v7  ;;  %3198 = vmatpush3.bf16.msra.mxu1 %v3384_v10 }
 0x1f0   : > { %3180 = vmatmul.mubr.msk.bf16.gmra.mxu0 %vm596_vm0, %v1133_v8 }
 0x278   : > { %v3153_v12 = vpop.f32.mrf.mxu0 }
 0x279   : > { %v1264_v13 = vadd.f32 %v3153_v12, %v3882_v11 }
 0x27a   : > { %v1255_v14 = vpop.f32.mrf.mxu0 }
 0x27b   : > { %3397 = vtanh.f32 %v1264_v13  ;;  %v1256_v15 = vadd.f32 %v3882_v11, %v1255_v14 }
 0x27c   : > { %v3154_v16 = vpop.f32.mrf.mxu0 }
 0x27d   : > { %v1267_v17 = vadd.f32 %v3154_v16, %v3882_v11  ;;  %3399 = vtanh.f32 %v1256_v15 }
 0x27e   : > { %v1258_v18 = vpop.f32.mrf.mxu0 }
 0x27f   : > { %3401 = vtanh.f32 %v1267_v17  ;;  %v1259_v19 = vadd.f32 %v3882_v11, %v1258_v18 }
 0x280   : > { %v3157_v34 = vpop.f32.mrf.mxu0 }
 0x281   : > { %3403 = vtanh.f32 %v1259_v19  ;;  %v1280_v20 = vadd.f32 %v3157_v34, %v3882_v11 }
 0x282   : > { %v1271_v21 = vpop.f32.mrf.mxu0 }
 0x283   : > { %3405 = vtanh.f32 %v1280_v20  ;;  %v1272_v22 = vadd.f32 %v3882_v11, %v1271_v21 }
 0x284   : > { %v3158_v23 = vpop.f32.mrf.mxu0 }
 0x285   : > { %v1283_v25 = vadd.f32 %v3158_v23, %v3882_v11  ;;  %3407 = vtanh.f32 %v1272_v22 }
 0x286   : > { %v1274_v26 = vpop.f32.mrf.mxu0 }
 0x287   : > { %3409 = vtanh.f32 %v1283_v25  ;;  %v1275_v27 = vadd.f32 %v3882_v11, %v1274_v26 }
 0x288   : > { %v3398_v28 = vpop.eup %3397  ;;  %v3161_v29 = vpop.f32.mrf.mxu0 }
 0x289   : > { %3411 = vtanh.f32 %v1275_v27  ;;  %v1296_v30 = vadd.f32 %v3161_v29, %v3882_v11  ;;  %2594 = vrot.lane.b32.xlu0 %v3398_v28, %s3597_s24 }
 0x28a   : > { %v1287_v31 = vpop.f32.mrf.mxu0  ;;  %v3400_v32 = vpop.eup %3399 }
 0x28b   : > { %3413 = vtanh.f32 %v1296_v30  ;;  %v1288_v33 = vadd.f32 %v3882_v11, %v1287_v31 }
 0x28c   : > { %v3402_v35 = vpop.eup %3401  ;;  %v3162_v36 = vpop.f32.mrf.mxu0 }
 0x28d   : > { %v1299_v37 = vadd.f32 %v3162_v36, %v3882_v11  ;;  %2596 = vrot.lane.b32.xlu1 %v3402_v35, %s3597_s24  ;;  %2590 = vrot.lane.b32.xlu0 %v3400_v32, %s3597_s24  ;;  %3415 = vtanh.f32 %v1288_v33  ;;  %v1415_v45 = vpack.c.bf16 %v3402_v35, %v3398_v28  ;;  %v3386_v28 = vld [vmem:[%s4477_s9 + $0x10] sm:$0xff]  }
 0x28e   : > { %v3404_v38 = vpop.eup %3403  ;;  %v1290_v39 = vpop.f32.mrf.mxu0  ;;  %3233 = vmatprep.subr.bf16.mxu0 %v3386_v28 }
 0x28f   : > { %3417 = vtanh.f32 %v1299_v37  ;;  %v1291_v40 = vadd.f32 %v3882_v11, %v1290_v39  ;;  %v1414_v41 = vpack.c.bf16 %v3404_v38, %v3400_v32  ;;  %3234 = vmatpush3.bf16.msra.mxu0 %v3386_v28 }
 0x290   : > { %v3406_v42 = vpop.eup %3405  ;;  %v3165_v43 = vpop.f32.mrf.mxu0 }
 0x291   : > { %3419 = vtanh.f32 %v1291_v40  ;;  %v1312_v44 = vadd.f32 %v3165_v43, %v3882_v11  ;;  %2592 = vrot.lane.b32.xlu1 %v3404_v38, %s3597_s24  ;;  %2602 = vrot.lane.b32.xlu0 %v3406_v42, %s3597_s24  ;;  %v3387_v43 = vld [vmem:[%s4477_s9 + $0x8] sm:$0xff]  }
 0x292   : > { %3199 = vmatprep.mubr.bf16.mxu1 %v1414_v41  ;;  %v1303_v46 = vpop.f32.mrf.mxu0  ;;  %v3408_v47 = vpop.eup %3407  ;;  %3235 = vmatprep.subr.bf16.mxu0 %v3387_v43 }
 0x293   : > { %3421 = vtanh.f32 %v1312_v44  ;;  %v1304_v48 = vadd.f32 %v3882_v11, %v1303_v46  ;;  %3200 = vmatmul.mubr.bf16.vlgmr.msra.gmra.mxu1 %v1415_v45  ;;  %v3388_v46 = vld [vmem:[%s4477_s9] sm:$0xff]   ;;  %3236 = vmatpush3.bf16.msra.mxu0 %v3387_v43 }
 0x294   : > { %v3410_v49 = vpop.eup %3409  ;;  %v3166_v50 = vpop.f32.mrf.mxu0  ;;  %3237 = vmatprep.subr.bf16.mxu0 %v3388_v46 }
 0x295   : > { %v1315_v51 = vadd.f32 %v3166_v50, %v3882_v11  ;;  %2604 = vrot.lane.b32.xlu1 %v3410_v49, %s3597_s24  ;;  %2598 = vrot.lane.b32.xlu0 %v3408_v47, %s3597_s24  ;;  %3423 = vtanh.f32 %v1304_v48  ;;  %v1417_v59 = vpack.c.bf16 %v3410_v49, %v3406_v42 }
 0x296   : > { %v3412_v52 = vpop.eup %3411  ;;  %v1306_v53 = vpop.f32.mrf.mxu0 }
 0x297   : > { %3425 = vtanh.f32 %v1315_v51  ;;  %v1307_v54 = vadd.f32 %v3882_v11, %v1306_v53  ;;  %v1416_v55 = vpack.c.bf16 %v3412_v52, %v3408_v47  ;;  %3238 = vmatpush3.bf16.msra.mxu0 %v3388_v46 }
 0x298   : > { %v3414_v56 = vpop.eup %3413  ;;  %v3169_v57 = vpop.f32.mrf.mxu0 }
 0x299   : > { %3427 = vtanh.f32 %v1307_v54  ;;  %v1328_v58 = vadd.f32 %v3169_v57, %v3882_v11  ;;  %2600 = vrot.lane.b32.xlu1 %v3412_v52, %s3597_s24  ;;  %2610 = vrot.lane.b32.xlu0 %v3414_v56, %s3597_s24 }
 0x29a   : > { %3203 = vmatprep.mubr.bf16.mxu1 %v1416_v55  ;;  %v1319_v60 = vpop.f32.mrf.mxu0  ;;  %v3416_v61 = vpop.eup %3415 }
 0x29b   : > { %3429 = vtanh.f32 %v1328_v58  ;;  %v1320_v62 = vadd.f32 %v3882_v11, %v1319_v60  ;;  %3204 = vmatmul.mubr.bf16.gmra.mxu1 %v1417_v59 }
 0x29c   : > { %v3418_v0 = vpop.eup %3417  ;;  %v3170_v1 = vpop.f32.mrf.mxu0 }
 0x29d   : > { %v1331_v2 = vadd.f32 %v3170_v1, %v3882_v11  ;;  %2612 = vrot.lane.b32.xlu1 %v3418_v0, %s3597_s24  ;;  %2606 = vrot.lane.b32.xlu0 %v3416_v61, %s3597_s24  ;;  %3431 = vtanh.f32 %v1320_v62  ;;  %v1419_v24 = vpack.c.bf16 %v3418_v0, %v3414_v56  ;;  %v3389_v1 = vld [vmem:[%s4479_s11 + $0x38] sm:$0xff]  }
 0x29e   : > { %v3420_v3 = vpop.eup %3419  ;;  %v1322_v4 = vpop.f32.mrf.mxu0  ;;  %3271 = vmatprep.subr.bf16.mxu0 %v3389_v1  ;;  %3319 = vmatprep.subr.bf16.mxu1 %v3389_v1 }
 0x29f   : > { %3433 = vtanh.f32 %v1331_v2  ;;  %v1323_v5 = vadd.f32 %v3882_v11, %v1322_v4  ;;  %v1418_v6 = vpack.c.bf16 %v3420_v3, %v3416_v61  ;;  %v3390_v2 = vld [vmem:[%s4479_s11 + $0x30] sm:$0xff]   ;;  %3327 = vmatpush3.bf16.msra.mxu1 %v3389_v1  ;;  %v3980_v4 = vld [vmem:[%s4479_s11 + $0x20] sm:$0xff]  }
 0x2a0   : > { %v3422_v7 = vpop.eup %3421  ;;  %v3173_v8 = vpop.f32.mrf.mxu0  ;;  %3320 = vmatprep.subr.bf16.mxu1 %v3390_v2 }
 0x2a1   : > { %3435 = vtanh.f32 %v1323_v5  ;;  %v1344_v9 = vadd.f32 %v3173_v8, %v3882_v11  ;;  %2608 = vrot.lane.b32.xlu1 %v3420_v3, %s3597_s24  ;;  %2618 = vrot.lane.b32.xlu0 %v3422_v7, %s3597_s24  ;;  %v3391_v3 = vld [vmem:[%s4479_s11 + $0x28] sm:$0xff]   ;;  %v3986_v5 = vld [vmem:[%s4479_s11 + $0x18] sm:$0xff]  }
 0x2a2   : > { %3207 = vmatprep.mubr.bf16.mxu1 %v1418_v6  ;;  %v1335_v10 = vpop.f32.mrf.mxu0  ;;  %v3424_v12 = vpop.eup %3423  ;;  %v3993_v6 = vld [vmem:[%s4479_s11 + $0x10] sm:$0xff]  }
 0x2a3   : > { %3437 = vtanh.f32 %v1344_v9  ;;  %v1336_v13 = vadd.f32 %v3882_v11, %v1335_v10  ;;  %3208 = vmatmul.mubr.bf16.gmra.mxu1 %v1419_v24  ;;  %v4008_v24 = vld [vmem:[%s4476_s8] ss:$0 sm:$0xff] }
 0x2a4   : > { %v3426_v14 = vpop.eup %3425  ;;  %v3174_v15 = vpop.f32.mrf.mxu0  ;;  %3328 = vmatpush3.bf16.msra.mxu1 %v3390_v2 }
 0x2a5   : > { %v1347_v16 = vadd.f32 %v3174_v15, %v3882_v11  ;;  %2620 = vrot.lane.b32.xlu1 %v3426_v14, %s3597_s24  ;;  %2614 = vrot.lane.b32.xlu0 %v3424_v12, %s3597_s24  ;;  %3439 = vtanh.f32 %v1336_v13  ;;  %v1421_v23 = vpack.c.bf16 %v3426_v14, %v3422_v7  ;;  %v4000_v7 = vld [vmem:[%s4479_s11 + $0x8] sm:$0xff]  }
 0x2a6   : > { %v3428_v17 = vpop.eup %3427  ;;  %v1338_v18 = vpop.f32.mrf.mxu0  ;;  %3321 = vmatprep.subr.bf16.mxu1 %v3391_v3 }
 0x2a7   : > { %3441 = vtanh.f32 %v1347_v16  ;;  %v1339_v19 = vadd.f32 %v3882_v11, %v1338_v18  ;;  %v1420_v34 = vpack.c.bf16 %v3428_v17, %v3424_v12 }
 0x2a8   : > { %v3430_v20 = vpop.eup %3429  ;;  %v3177_v21 = vpop.f32.mrf.mxu0  ;;  %3329 = vmatpush3.bf16.msra.mxu1 %v3391_v3 }
 0x2a9   : > { %3443 = vtanh.f32 %v1339_v19  ;;  %v1360_v22 = vadd.f32 %v3177_v21, %v3882_v11  ;;  %2616 = vrot.lane.b32.xlu1 %v3428_v17, %s3597_s24  ;;  %2626 = vrot.lane.b32.xlu0 %v3430_v20, %s3597_s24 }
 0x2aa   : > { %3211 = vmatprep.mubr.bf16.mxu1 %v1420_v34  ;;  %v1351_v25 = vpop.f32.mrf.mxu0  ;;  %v3432_v26 = vpop.eup %3431  ;;  %3322 = vmatprep.subr.bf16.mxu1 %v3980_v4 }
 0x2ab   : > { %3445 = vtanh.f32 %v1360_v22  ;;  %v1352_v27 = vadd.f32 %v3882_v11, %v1351_v25  ;;  %3212 = vmatmul.mubr.bf16.gmra.mxu1 %v1421_v23 }
 0x2ac   : > { %v3434_v29 = vpop.eup %3433  ;;  %v3178_v30 = vpop.f32.mrf.mxu0  ;;  %3330 = vmatpush3.bf16.msra.mxu1 %v3980_v4 }
 0x2ad   : > { %v1363_v31 = vadd.f32 %v3178_v30, %v3882_v11  ;;  %2628 = vrot.lane.b32.xlu1 %v3434_v29, %s3597_s24  ;;  %2622 = vrot.lane.b32.xlu0 %v3432_v26, %s3597_s24  ;;  %3447 = vtanh.f32 %v1352_v27  ;;  %v1423_v39 = vpack.c.bf16 %v3434_v29, %v3430_v20 }
 0x2ae   : > { %v3436_v32 = vpop.eup %3435  ;;  %v1354_v33 = vpop.f32.mrf.mxu0  ;;  %3323 = vmatprep.subr.bf16.mxu1 %v3986_v5 }
 0x2af   : > { %3449 = vtanh.f32 %v1363_v31  ;;  %v1355_v35 = vadd.f32 %v3882_v11, %v1354_v33  ;;  %v1422_v36 = vpack.c.bf16 %v3436_v32, %v3432_v26 }
 0x2b0   : > { %v3438_v37 = vpop.eup %3437  ;;  %v3181_v38 = vpop.f32.mrf.mxu0  ;;  %3331 = vmatpush3.bf16.msra.mxu1 %v3986_v5 }
 0x2b1   : > { %3451 = vtanh.f32 %v1355_v35  ;;  %2624 = vrot.lane.b32.xlu1 %v3436_v32, %s3597_s24  ;;  %2634 = vrot.lane.b32.xlu0 %v3438_v37, %s3597_s24  ;;  %v1376_v50 = vadd.f32 %v3181_v38, %v3882_v11 }
 0x2b2   : > { %3215 = vmatprep.mubr.bf16.mxu1 %v1422_v36  ;;  %v1367_v40 = vpop.f32.mrf.mxu0  ;;  %v3440_v41 = vpop.eup %3439  ;;  %3324 = vmatprep.subr.bf16.mxu1 %v3993_v6 }
 0x2b3   : > { %v1368_v42 = vadd.f32 %v3882_v11, %v1367_v40  ;;  %3216 = vmatmul.mubr.bf16.gmra.mxu1 %v1423_v39 }
 0x2b4   : > { %v3442_v44 = vpop.eup %3441  ;;  %v3182_v45 = vpop.f32.mrf.mxu0  ;;  %3332 = vmatpush3.bf16.msra.mxu1 %v3993_v6 }
 0x2b5   : > { %v1379_v47 = vadd.f32 %v3182_v45, %v3882_v11  ;;  %2636 = vrot.lane.b32.xlu1 %v3442_v44, %s3597_s24  ;;  %2630 = vrot.lane.b32.xlu0 %v3440_v41, %s3597_s24  ;;  %3453 = vtanh.f32 %v1368_v42  ;;  %v1425_v54 = vpack.c.bf16 %v3442_v44, %v3438_v37 }
 0x2b6   : > { %v3444_v48 = vpop.eup %3443  ;;  %v1370_v49 = vpop.f32.mrf.mxu0  ;;  %3325 = vmatprep.subr.bf16.mxu1 %v4000_v7 }
 0x2b7   : > { %v1371_v51 = vadd.f32 %v3882_v11, %v1370_v49  ;;  %v1424_v52 = vpack.c.bf16 %v3444_v48, %v3440_v41  ;;  %3455 = vtanh.f32 %v1379_v47 }
 0x2b8   : > { %v3446_v53 = vpop.eup %3445  ;;  %3333 = vmatpush3.bf16.msra.mxu1 %v4000_v7 }
 0x2b9   : > { %3457 = vtanh.f32 %v1371_v51  ;;  %2632 = vrot.lane.b32.xlu1 %v3444_v48, %s3597_s24  ;;  %2642 = vrot.lane.b32.xlu0 %v3446_v53, %s3597_s24 }
 0x2ba   : > { %3219 = vmatprep.mubr.bf16.mxu1 %v1424_v52  ;;  %v3448_v55 = vpop.eup %3447  ;;  %3459 = vtanh.f32 %v1376_v50 }
 0x2bb   : > { %3220 = vmatmul.mubr.bf16.gmra.mxu1 %v1425_v54 }
 0x2bc   : > { %v3450_v56 = vpop.eup %3449 }
 0x2bd   : > { %2644 = vrot.lane.b32.xlu1 %v3450_v56, %s3597_s24  ;;  %2638 = vrot.lane.b32.xlu0 %v3448_v55, %s3597_s24  ;;  %v1427_v58 = vpack.c.bf16 %v3450_v56, %v3446_v53 }
 0x2be   : > { %v3452_v11 = vpop.eup %3451 }
 0x2bf   : > { %v1426_v57 = vpack.c.bf16 %v3452_v11, %v3448_v55 }
 0x2c1   : > { %2640 = vrot.lane.b32.xlu1 %v3452_v11, %s3597_s24  ;;  %3223 = vmatprep.mubr.bf16.mxu1 %v1426_v57 }
 0x2c2   : > { %v3956_v59 = vpop.eup %3453 }
 0x2c3   : > { %3224 = vmatmul.mubr.bf16.gmra.mxu1 %v1427_v58 }
 0x2c4   : > { %v3958_v60 = vpop.eup %3455 }
 0x2c6   : > { %v3960_v61 = vpop.eup %3457 }
 0x2c7   : > { %v1428_v62 = vpack.c.bf16 %v3960_v61, %v3956_v59  ;;  %v3964_v63 = vpop.eup %3459 }
 0x2c8   : > { %v1429_v0 = vpack.c.bf16 %v3958_v60, %v3964_v63 }
 0x2c9   : > { %3227 = vmatprep.mubr.bf16.mxu1 %v1428_v62 }
 0x2cb   : > { %3228 = vmatmul.mubr.bf16.gmra.mxu1 %v1429_v0 }
 0x353   : > { %v3201_v8 = vpop.f32.mrf.mxu1 }
 0x354   : > { %v1544_v14 = vadd.f32 %v3201_v8, %v4008_v24 }
 0x355   : > { %v1535_v9 = vpop.f32.mrf.mxu1 }
 0x356   : > { %v1536_v12 = vadd.f32 %v4008_v24, %v1535_v9  ;;  %v1664_v20 = vmax.f32 %v1544_v14, 0.0 }
 0x357   : > { %v3202_v10 = vpop.f32.mrf.mxu1 }
 0x358   : > { %v1547_v13 = vadd.f32 %v3202_v10, %v4008_v24  ;;  %v1662_v19 = vmax.f32 %v1536_v12, 0.0 }
 0x359   : > { %v1538_v15 = vpop.f32.mrf.mxu1 }
 0x35a   : > { %v1539_v16 = vadd.f32 %v4008_v24, %v1538_v15  ;;  %v1665_v17 = vmax.f32 %v1547_v13, 0.0 }
 0x35b   : > { %v3205_v18 = vpop.f32.mrf.mxu1 }
 0x35c   : > { %v1663_v34 = vmax.f32 %v1539_v16, 0.0  ;;  %v1695_v23 = vpack.c.bf16 %v1665_v17, %v1664_v20  ;;  %v1560_v28 = vadd.f32 %v3205_v18, %v4008_v24 }
 0x35d   : > { %v1551_v21 = vpop.f32.mrf.mxu1 }
 0x35e   : > { %v1694_v22 = vpack.c.bf16 %v1663_v34, %v1662_v19  ;;  %v1552_v26 = vadd.f32 %v4008_v24, %v1551_v21  ;;  %v1668_v36 = vmax.f32 %v1560_v28, 0.0 }
 0x35f   : > { %v3206_v25 = vpop.f32.mrf.mxu1 }
 0x360   : > { %v1563_v27 = vadd.f32 %v3206_v25, %v4008_v24  ;;  %3239 = vmatprep.mubr.msk.bf16.mxu0 %vm596_vm0, %v1694_v22  ;;  %v1666_v33 = vmax.f32 %v1552_v26, 0.0 }
 0x361   : > { %v1554_v29 = vpop.f32.mrf.mxu1  ;;  %3240 = vmatmul.mubr.msk.bf16.vlgmr.msra.gmra.mxu0 %vm596_vm0, %v1695_v23 }
 0x362   : > { %v1555_v30 = vadd.f32 %v4008_v24, %v1554_v29  ;;  %3272 = vmatpush3.bf16.msra.mxu0 %v3389_v1  ;;  %v1669_v31 = vmax.f32 %v1563_v27, 0.0 }
 0x363   : > { %v3209_v32 = vpop.f32.mrf.mxu1  ;;  %3273 = vmatprep.subr.bf16.mxu0 %v3390_v2 }
 0x364   : > { %v1667_v35 = vmax.f32 %v1555_v30, 0.0  ;;  %v1697_v39 = vpack.c.bf16 %v1669_v31, %v1668_v36  ;;  %v1576_v43 = vadd.f32 %v3209_v32, %v4008_v24 }
 0x365   : > { %v1567_v37 = vpop.f32.mrf.mxu1 }
 0x366   : > { %v1696_v38 = vpack.c.bf16 %v1667_v35, %v1666_v33  ;;  %3274 = vmatpush3.bf16.msra.mxu0 %v3390_v2  ;;  %v1568_v41 = vadd.f32 %v4008_v24, %v1567_v37  ;;  %v1672_v50 = vmax.f32 %v1576_v43, 0.0 }
 0x367   : > { %v3210_v40 = vpop.f32.mrf.mxu1  ;;  %3275 = vmatprep.subr.bf16.mxu0 %v3391_v3 }
 0x368   : > { %v1579_v42 = vadd.f32 %v3210_v40, %v4008_v24  ;;  %3243 = vmatprep.mubr.msk.bf16.mxu0 %vm596_vm0, %v1696_v38  ;;  %v1670_v48 = vmax.f32 %v1568_v41, 0.0 }
 0x369   : > { %v1570_v44 = vpop.f32.mrf.mxu1  ;;  %3244 = vmatmul.mubr.msk.bf16.gmra.mxu0 %vm596_vm0, %v1697_v39 }
 0x36a   : > { %v1571_v45 = vadd.f32 %v4008_v24, %v1570_v44  ;;  %3276 = vmatpush3.bf16.msra.mxu0 %v3391_v3  ;;  %v1673_v46 = vmax.f32 %v1579_v42, 0.0 }
 0x36b   : > { %v3213_v47 = vpop.f32.mrf.mxu1  ;;  %3277 = vmatprep.subr.bf16.mxu0 %v3980_v4 }
 0x36c   : > { %v1671_v49 = vmax.f32 %v1571_v45, 0.0  ;;  %v1699_v53 = vpack.c.bf16 %v1673_v46, %v1672_v50  ;;  %v1592_v11 = vadd.f32 %v3213_v47, %v4008_v24 }
 0x36d   : > { %v1583_v51 = vpop.f32.mrf.mxu1 }
 0x36e   : > { %v1698_v52 = vpack.c.bf16 %v1671_v49, %v1670_v48  ;;  %3278 = vmatpush3.bf16.msra.mxu0 %v3980_v4  ;;  %v1584_v55 = vadd.f32 %v4008_v24, %v1583_v51  ;;  %v1676_v3 = vmax.f32 %v1592_v11, 0.0 }
 0x36f   : > { %v3214_v54 = vpop.f32.mrf.mxu1  ;;  %3279 = vmatprep.subr.bf16.mxu0 %v3986_v5 }
 0x370   : > { %v1595_v56 = vadd.f32 %v3214_v54, %v4008_v24  ;;  %3247 = vmatprep.mubr.msk.bf16.mxu0 %vm596_vm0, %v1698_v52  ;;  %v1674_v1 = vmax.f32 %v1584_v55, 0.0 }
 0x371   : > { %v1586_v57 = vpop.f32.mrf.mxu1  ;;  %3248 = vmatmul.mubr.msk.bf16.gmra.mxu0 %vm596_vm0, %v1699_v53 }
 0x372   : > { %v1587_v58 = vadd.f32 %v4008_v24, %v1586_v57  ;;  %3280 = vmatpush3.bf16.msra.mxu0 %v3986_v5  ;;  %v1677_v62 = vmax.f32 %v1595_v56, 0.0 }
 0x373   : > { %v3217_v0 = vpop.f32.mrf.mxu1  ;;  %3281 = vmatprep.subr.bf16.mxu0 %v3993_v6 }
 0x374   : > { %v1675_v2 = vmax.f32 %v1587_v58, 0.0  ;;  %v1701_v9 = vpack.c.bf16 %v1677_v62, %v1676_v3  ;;  %v1608_v5 = vadd.f32 %v3217_v0, %v4008_v24 }
 0x375   : > { %v1599_v4 = vpop.f32.mrf.mxu1 }
 0x376   : > { %v1700_v8 = vpack.c.bf16 %v1675_v2, %v1674_v1  ;;  %3282 = vmatpush3.bf16.msra.mxu0 %v3993_v6  ;;  %v1600_v12 = vadd.f32 %v4008_v24, %v1599_v4  ;;  %v1680_v19 = vmax.f32 %v1608_v5, 0.0  ;;  %v3396_v2 = vld [vmem:[%s4479_s11] sm:$0xff]  }
 0x377   : > { %v3218_v10 = vpop.f32.mrf.mxu1  ;;  %3283 = vmatprep.subr.bf16.mxu0 %v4000_v7  ;;  %3326 = vmatprep.subr.bf16.mxu1 %v3396_v2  ;;  %v4072_v4 = vld [vmem:[%s4478_s10] ss:$0 sm:$0xff] }
 0x378   : > { %v1611_v13 = vadd.f32 %v3218_v10, %v4008_v24  ;;  %3251 = vmatprep.mubr.msk.bf16.mxu0 %vm596_vm0, %v1700_v8  ;;  %v1678_v17 = vmax.f32 %v1600_v12, 0.0  ;;  %3334 = vmatpush3.bf16.msra.mxu1 %v3396_v2 }
 0x379   : > { %v1602_v14 = vpop.f32.mrf.mxu1  ;;  %3252 = vmatmul.mubr.msk.bf16.gmra.mxu0 %vm596_vm0, %v1701_v9 }
 0x37a   : > { %v1603_v15 = vadd.f32 %v4008_v24, %v1602_v14  ;;  %3284 = vmatpush3.bf16.msra.mxu0 %v4000_v7  ;;  %v1681_v6 = vmax.f32 %v1611_v13, 0.0 }
 0x37b   : > { %v3221_v16 = vpop.f32.mrf.mxu1  ;;  %3285 = vmatprep.subr.bf16.mxu0 %v3396_v2 }
 0x37c   : > { %v1679_v18 = vmax.f32 %v1603_v15, 0.0  ;;  %v1703_v21 = vpack.c.bf16 %v1681_v6, %v1680_v19  ;;  %v1624_v26 = vadd.f32 %v3221_v16, %v4008_v24 }
 0x37d   : > { %v1615_v34 = vpop.f32.mrf.mxu1 }
 0x37e   : > { %v1702_v20 = vpack.c.bf16 %v1679_v18, %v1678_v17  ;;  %v1616_v23 = vadd.f32 %v4008_v24, %v1615_v34  ;;  %v1684_v32 = vmax.f32 %v1624_v26, 0.0  ;;  %3286 = vmatpush3.bf16.msra.mxu0 %v3396_v2 }
 0x37f   : > { %v3222_v22 = vpop.f32.mrf.mxu1 }
 0x380   : > { %v1627_v25 = vadd.f32 %v3222_v22, %v4008_v24  ;;  %3255 = vmatprep.mubr.msk.bf16.mxu0 %vm596_vm0, %v1702_v20  ;;  %v1682_v30 = vmax.f32 %v1616_v23, 0.0 }
 0x381   : > { %v1618_v27 = vpop.f32.mrf.mxu1  ;;  %3256 = vmatmul.mubr.msk.bf16.gmra.mxu0 %vm596_vm0, %v1703_v21 }
 0x382   : > { %v1619_v7 = vadd.f32 %v4008_v24, %v1618_v27  ;;  %v1685_v28 = vmax.f32 %v1627_v25, 0.0 }
 0x383   : > { %v3225_v29 = vpop.f32.mrf.mxu1 }
 0x384   : > { %v1683_v31 = vmax.f32 %v1619_v7, 0.0  ;;  %v1705_v36 = vpack.c.bf16 %v1685_v28, %v1684_v32  ;;  %v1640_v40 = vadd.f32 %v3225_v29, %v4008_v24 }
 0x385   : > { %v1631_v33 = vpop.f32.mrf.mxu1 }
 0x386   : > { %v1704_v35 = vpack.c.bf16 %v1683_v31, %v1682_v30  ;;  %v1632_v38 = vadd.f32 %v4008_v24, %v1631_v33  ;;  %v1688_v47 = vmax.f32 %v1640_v40, 0.0 }
 0x387   : > { %v3226_v37 = vpop.f32.mrf.mxu1 }
 0x388   : > { %v1643_v39 = vadd.f32 %v3226_v37, %v4008_v24  ;;  %3259 = vmatprep.mubr.msk.bf16.mxu0 %vm596_vm0, %v1704_v35  ;;  %v1686_v45 = vmax.f32 %v1632_v38, 0.0 }
 0x389   : > { %v1634_v41 = vpop.f32.mrf.mxu1  ;;  %3260 = vmatmul.mubr.msk.bf16.gmra.mxu0 %vm596_vm0, %v1705_v36 }
 0x38a   : > { %v1635_v42 = vadd.f32 %v4008_v24, %v1634_v41  ;;  %v1689_v43 = vmax.f32 %v1643_v39, 0.0 }
 0x38b   : > { %v3229_v44 = vpop.f32.mrf.mxu1 }
 0x38c   : > { %v1687_v46 = vmax.f32 %v1635_v42, 0.0  ;;  %v1707_v50 = vpack.c.bf16 %v1689_v43, %v1688_v47  ;;  %v1656_v54 = vadd.f32 %v3229_v44, %v4008_v24 }
 0x38d   : > { %v1647_v48 = vpop.f32.mrf.mxu1 }
 0x38e   : > { %v1706_v49 = vpack.c.bf16 %v1687_v46, %v1686_v45  ;;  %v1648_v52 = vadd.f32 %v4008_v24, %v1647_v48  ;;  %v1692_v62 = vmax.f32 %v1656_v54, 0.0 }
 0x38f   : > { %v3230_v51 = vpop.f32.mrf.mxu1 }
 0x390   : > { %v1659_v53 = vadd.f32 %v3230_v51, %v4008_v24  ;;  %3263 = vmatprep.mubr.msk.bf16.mxu0 %vm596_vm0, %v1706_v49  ;;  %v1690_v57 = vmax.f32 %v1648_v52, 0.0 }
 0x391   : > { %v1650_v55 = vpop.f32.mrf.mxu1  ;;  %3264 = vmatmul.mubr.msk.bf16.gmra.mxu0 %vm596_vm0, %v1707_v50 }
 0x392   : > { %v1651_v56 = vadd.f32 %v4008_v24, %v1650_v55  ;;  %v1693_v11 = vmax.f32 %v1659_v53, 0.0 }
 0x394   : > { %v1691_v58 = vmax.f32 %v1651_v56, 0.0  ;;  %v1709_v1 = vpack.c.bf16 %v1693_v11, %v1692_v62 }
 0x396   : > { %v1708_v0 = vpack.c.bf16 %v1691_v58, %v1690_v57 }
 0x398   : > { %3267 = vmatprep.mubr.msk.bf16.mxu0 %vm596_vm0, %v1708_v0 }
 0x399   : > { %3268 = vmatmul.mubr.msk.bf16.gmra.mxu0 %vm596_vm0, %v1709_v1 }
 0x421   : > { %v3241_v3 = vpop.f32.mrf.mxu0 }
 0x422   : > { %v1840_v12 = vadd.f32 %v3241_v3, %v4072_v4 }
 0x423   : > { %v1831_v24 = vpop.f32.mrf.mxu0 }
 0x424   : > { %v1832_v9 = vadd.f32 %v4072_v4, %v1831_v24  ;;  %v1960_v17 = vmax.f32 %v1840_v12, 0.0 }
 0x425   : > { %v3242_v8 = vpop.f32.mrf.mxu0 }
 0x426   : > { %v1843_v10 = vadd.f32 %v3242_v8, %v4072_v4  ;;  %v1958_v6 = vmax.f32 %v1832_v9, 0.0 }
 0x427   : > { %v1834_v13 = vpop.f32.mrf.mxu0 }
 0x428   : > { %v1835_v5 = vadd.f32 %v4072_v4, %v1834_v13  ;;  %v1961_v14 = vmax.f32 %v1843_v10, 0.0 }
 0x429   : > { %v3245_v15 = vpop.f32.mrf.mxu0 }
 0x42a   : > { %v1959_v16 = vmax.f32 %v1835_v5, 0.0  ;;  %v1991_v34 = vpack.c.bf16 %v1961_v14, %v1960_v17  ;;  %v1856_v23 = vadd.f32 %v3245_v15, %v4072_v4 }
 0x42b   : > { %v1847_v18 = vpop.f32.mrf.mxu0 }
 0x42c   : > { %v1990_v19 = vpack.c.bf16 %v1959_v16, %v1958_v6  ;;  %v1848_v21 = vadd.f32 %v4072_v4, %v1847_v18  ;;  %v1964_v30 = vmax.f32 %v1856_v23, 0.0 }
 0x42d   : > { %v3246_v20 = vpop.f32.mrf.mxu0 }
 0x42e   : > { %v1859_v22 = vadd.f32 %v3246_v20, %v4072_v4  ;;  %3287 = vmatprep.mubr.bf16.mxu0 %v1990_v19  ;;  %v1962_v28 = vmax.f32 %v1848_v21, 0.0 }
 0x42f   : > { %v1850_v25 = vpop.f32.mrf.mxu0  ;;  %3288 = vmatmul.mubr.bf16.vlgmr.msra.gmra.mxu0 %v1991_v34 }
 0x430   : > { %v1851_v26 = vadd.f32 %v4072_v4, %v1850_v25  ;;  %v1965_v27 = vmax.f32 %v1859_v22, 0.0 }
 0x431   : > { %v3249_v7 = vpop.f32.mrf.mxu0 }
 0x432   : > { %v1963_v29 = vmax.f32 %v1851_v26, 0.0  ;;  %v1993_v33 = vpack.c.bf16 %v1965_v27, %v1964_v30  ;;  %v1872_v38 = vadd.f32 %v3249_v7, %v4072_v4 }
 0x433   : > { %v1863_v31 = vpop.f32.mrf.mxu0 }
 0x434   : > { %v1992_v32 = vpack.c.bf16 %v1963_v29, %v1962_v28  ;;  %v1864_v36 = vadd.f32 %v4072_v4, %v1863_v31  ;;  %v1968_v45 = vmax.f32 %v1872_v38, 0.0 }
 0x435   : > { %v3250_v35 = vpop.f32.mrf.mxu0 }
 0x436   : > { %v1875_v37 = vadd.f32 %v3250_v35, %v4072_v4  ;;  %3291 = vmatprep.mubr.bf16.mxu1 %v1992_v32  ;;  %v1966_v43 = vmax.f32 %v1864_v36, 0.0 }
 0x437   : > { %v1866_v39 = vpop.f32.mrf.mxu0  ;;  %3292 = vmatmul.mubr.bf16.vlgmr.msra.gmra.mxu1 %v1993_v33 }
 0x438   : > { %v1867_v40 = vadd.f32 %v4072_v4, %v1866_v39  ;;  %v1969_v41 = vmax.f32 %v1875_v37, 0.0 }
 0x439   : > { %v3253_v42 = vpop.f32.mrf.mxu0 }
 0x43a   : > { %v1967_v44 = vmax.f32 %v1867_v40, 0.0  ;;  %v1995_v48 = vpack.c.bf16 %v1969_v41, %v1968_v45  ;;  %v1888_v52 = vadd.f32 %v3253_v42, %v4072_v4 }
 0x43b   : > { %v1879_v46 = vpop.f32.mrf.mxu0 }
 0x43c   : > { %v1994_v47 = vpack.c.bf16 %v1967_v44, %v1966_v43  ;;  %v1880_v50 = vadd.f32 %v4072_v4, %v1879_v46  ;;  %v1972_v58 = vmax.f32 %v1888_v52, 0.0 }
 0x43d   : > { %v3254_v49 = vpop.f32.mrf.mxu0 }
 0x43e   : > { %v1891_v51 = vadd.f32 %v3254_v49, %v4072_v4  ;;  %3295 = vmatprep.mubr.bf16.mxu1 %v1994_v47  ;;  %v1970_v11 = vmax.f32 %v1880_v50, 0.0 }
 0x43f   : > { %v1882_v53 = vpop.f32.mrf.mxu0  ;;  %3296 = vmatmul.mubr.bf16.gmra.mxu1 %v1995_v48 }
 0x440   : > { %v1883_v54 = vadd.f32 %v4072_v4, %v1882_v53  ;;  %v1973_v55 = vmax.f32 %v1891_v51, 0.0 }
 0x441   : > { %v3257_v56 = vpop.f32.mrf.mxu0 }
 0x442   : > { %v1971_v57 = vmax.f32 %v1883_v54, 0.0  ;;  %v1997_v1 = vpack.c.bf16 %v1973_v55, %v1972_v58  ;;  %v1904_v8 = vadd.f32 %v3257_v56, %v4072_v4 }
 0x443   : > { %v1895_v62 = vpop.f32.mrf.mxu0 }
 0x444   : > { %v1996_v0 = vpack.c.bf16 %v1971_v57, %v1970_v11  ;;  %v1896_v3 = vadd.f32 %v4072_v4, %v1895_v62  ;;  %v1976_v15 = vmax.f32 %v1904_v8, 0.0  ;;  %v4109_v57 = vld [vmem:[%s4480_s12] ss:$0 sm:$0xff] }
 0x445   : > { %v3258_v2 = vpop.f32.mrf.mxu0 }
 0x446   : > { %v1907_v24 = vadd.f32 %v3258_v2, %v4072_v4  ;;  %3299 = vmatprep.mubr.bf16.mxu1 %v1996_v0  ;;  %v1974_v5 = vmax.f32 %v1896_v3, 0.0 }
 0x447   : > { %v1898_v9 = vpop.f32.mrf.mxu0  ;;  %3300 = vmatmul.mubr.bf16.gmra.mxu1 %v1997_v1 }
 0x448   : > { %v1899_v10 = vadd.f32 %v4072_v4, %v1898_v9  ;;  %v1977_v12 = vmax.f32 %v1907_v24, 0.0 }
 0x449   : > { %v3261_v13 = vpop.f32.mrf.mxu0 }
 0x44a   : > { %v1975_v14 = vmax.f32 %v1899_v10, 0.0  ;;  %v1999_v17 = vpack.c.bf16 %v1977_v12, %v1976_v15  ;;  %v1920_v20 = vadd.f32 %v3261_v13, %v4072_v4 }
 0x44b   : > { %v1911_v6 = vpop.f32.mrf.mxu0 }
 0x44c   : > { %v1998_v16 = vpack.c.bf16 %v1975_v14, %v1974_v5  ;;  %v1912_v19 = vadd.f32 %v4072_v4, %v1911_v6  ;;  %v1980_v7 = vmax.f32 %v1920_v20, 0.0 }
 0x44d   : > { %v3262_v18 = vpop.f32.mrf.mxu0 }
 0x44e   : > { %v1923_v34 = vadd.f32 %v3262_v18, %v4072_v4  ;;  %3303 = vmatprep.mubr.bf16.mxu1 %v1998_v16  ;;  %v1978_v26 = vmax.f32 %v1912_v19, 0.0 }
 0x44f   : > { %v1914_v21 = vpop.f32.mrf.mxu0  ;;  %3304 = vmatmul.mubr.bf16.gmra.mxu1 %v1999_v17 }
 0x450   : > { %v1915_v22 = vadd.f32 %v4072_v4, %v1914_v21  ;;  %v1981_v23 = vmax.f32 %v1923_v34, 0.0 }
 0x451   : > { %v3265_v25 = vpop.f32.mrf.mxu0 }
 0x452   : > { %v1979_v27 = vmax.f32 %v1915_v22, 0.0  ;;  %v2001_v30 = vpack.c.bf16 %v1981_v23, %v1980_v7  ;;  %v1936_v35 = vadd.f32 %v3265_v25, %v4072_v4 }
 0x453   : > { %v1927_v28 = vpop.f32.mrf.mxu0 }
 0x454   : > { %v2000_v29 = vpack.c.bf16 %v1979_v27, %v1978_v26  ;;  %v1928_v32 = vadd.f32 %v4072_v4, %v1927_v28  ;;  %v1984_v42 = vmax.f32 %v1936_v35, 0.0 }
 0x455   : > { %v3266_v31 = vpop.f32.mrf.mxu0 }
 0x456   : > { %v1939_v33 = vadd.f32 %v3266_v31, %v4072_v4  ;;  %3307 = vmatprep.mubr.bf16.mxu1 %v2000_v29  ;;  %v1982_v40 = vmax.f32 %v1928_v32, 0.0 }
 0x457   : > { %v1930_v36 = vpop.f32.mrf.mxu0  ;;  %3308 = vmatmul.mubr.bf16.gmra.mxu1 %v2001_v30 }
 0x458   : > { %v1931_v37 = vadd.f32 %v4072_v4, %v1930_v36  ;;  %v1985_v38 = vmax.f32 %v1939_v33, 0.0 }
 0x459   : > { %v3269_v39 = vpop.f32.mrf.mxu0 }
 0x45a   : > { %v1983_v41 = vmax.f32 %v1931_v37, 0.0  ;;  %v2003_v45 = vpack.c.bf16 %v1985_v38, %v1984_v42  ;;  %v1952_v49 = vadd.f32 %v3269_v39, %v4072_v4 }
 0x45b   : > { %v1943_v43 = vpop.f32.mrf.mxu0 }
 0x45c   : > { %v2002_v44 = vpack.c.bf16 %v1983_v41, %v1982_v40  ;;  %v1944_v47 = vadd.f32 %v4072_v4, %v1943_v43  ;;  %v1988_v55 = vmax.f32 %v1952_v49, 0.0 }
 0x45d   : > { %v3270_v46 = vpop.f32.mrf.mxu0 }
 0x45e   : > { %v1955_v48 = vadd.f32 %v3270_v46, %v4072_v4  ;;  %3311 = vmatprep.mubr.bf16.mxu1 %v2002_v44  ;;  %v1986_v53 = vmax.f32 %v1944_v47, 0.0 }
 0x45f   : > { %v1946_v50 = vpop.f32.mrf.mxu0  ;;  %3312 = vmatmul.mubr.bf16.gmra.mxu1 %v2003_v45 }
 0x460   : > { %v1947_v51 = vadd.f32 %v4072_v4, %v1946_v50  ;;  %v1989_v52 = vmax.f32 %v1955_v48, 0.0 }
 0x462   : > { %v1987_v54 = vmax.f32 %v1947_v51, 0.0  ;;  %v2005_v11 = vpack.c.bf16 %v1989_v52, %v1988_v55 }
 0x464   : > { %v2004_v56 = vpack.c.bf16 %v1987_v54, %v1986_v53 }
 0x466   : > { %3315 = vmatprep.mubr.bf16.mxu1 %v2004_v56 }
 0x467   : > { %3316 = vmatmul.mubr.bf16.gmra.mxu1 %v2005_v11 }
 0x4ef   : > { %v3289_v58 = vpop.f32.mrf.mxu0 }
 0x4f0   : > { %v2120_v62 = vadd.f32 %v3289_v58, %v4109_v57 }
 0x4f1   : > { %v2111_v0 = vpop.f32.mrf.mxu0 }
 0x4f2   : > { %v2891_v1 = vmul.f32 -1.442695, %v2120_v62  ;;  %v2112_v4 = vadd.f32 %v4109_v57, %v2111_v0 }
 0x4f3   : > { %v3290_v2 = vpop.f32.mrf.mxu0 }
 0x4f4   : > { %3461 = vpow2.f32 %v2891_v1  ;;  %v2889_v3 = vmul.f32 -1.442695, %v2112_v4  ;;  %v2123_v24 = vadd.f32 %v3290_v2, %v4109_v57 }
 0x4f5   : > { %v2114_v8 = vpop.f32.mrf.mxu0 }
 0x4f6   : > { %3463 = vpow2.f32 %v2889_v3  ;;  %v2892_v9 = vmul.f32 -1.442695, %v2123_v24  ;;  %v2115_v10 = vadd.f32 %v4109_v57, %v2114_v8 }
 0x4f7   : > { %v3293_v12 = vpop.f32.mrf.mxu1 }
 0x4f8   : > { %3465 = vpow2.f32 %v2892_v9  ;;  %v2890_v13 = vmul.f32 -1.442695, %v2115_v10  ;;  %v2136_v5 = vadd.f32 %v3293_v12, %v4109_v57 }
 0x4f9   : > { %v2127_v14 = vpop.f32.mrf.mxu1 }
 0x4fa   : > { %3467 = vpow2.f32 %v2890_v13  ;;  %v2895_v15 = vmul.f32 -1.442695, %v2136_v5  ;;  %v2128_v6 = vadd.f32 %v4109_v57, %v2127_v14 }
 0x4fb   : > { %v3294_v16 = vpop.f32.mrf.mxu1 }
 0x4fc   : > { %3469 = vpow2.f32 %v2895_v15  ;;  %v2893_v17 = vmul.f32 -1.442695, %v2128_v6  ;;  %v2139_v18 = vadd.f32 %v3294_v16, %v4109_v57 }
 0x4fd   : > { %v2130_v19 = vpop.f32.mrf.mxu1 }
 0x4fe   : > { %3471 = vpow2.f32 %v2893_v17  ;;  %v2896_v34 = vmul.f32 -1.442695, %v2139_v18  ;;  %v2131_v20 = vadd.f32 %v4109_v57, %v2130_v19 }
 0x4ff   : > { %v3297_v21 = vpop.f32.mrf.mxu1 }
 0x500   : > { %3473 = vpow2.f32 %v2896_v34  ;;  %v2894_v22 = vmul.f32 -1.442695, %v2131_v20  ;;  %v2152_v23 = vadd.f32 %v3297_v21, %v4109_v57 }
 0x501   : > { %v3462_v25 = vpop.eup %3461  ;;  %v2143_v26 = vpop.f32.mrf.mxu1 }
 0x502   : > { %v2336_v27 = vadd.f32 1.0, %v3462_v25  ;;  %3475 = vpow2.f32 %v2894_v22  ;;  %v2899_v7 = vmul.f32 -1.442695, %v2152_v23  ;;  %v2144_v28 = vadd.f32 %v4109_v57, %v2143_v26 }
 0x503   : > { %v3464_v29 = vpop.eup %3463  ;;  %v3298_v30 = vpop.f32.mrf.mxu1 }
 0x504   : > { %3477 = vrcp.f32 %v2336_v27  ;;  %v2334_v31 = vadd.f32 1.0, %v3464_v29  ;;  %v2897_v32 = vmul.f32 -1.442695, %v2144_v28  ;;  %v2155_v33 = vadd.f32 %v3298_v30, %v4109_v57 }
 0x505   : > { %v3466_v35 = vpop.eup %3465  ;;  %3479 = vpow2.f32 %v2899_v7  ;;  %v2146_v36 = vpop.f32.mrf.mxu1 }
 0x506   : > { %3481 = vrcp.f32 %v2334_v31  ;;  %v2337_v37 = vadd.f32 1.0, %v3466_v35  ;;  %v2900_v38 = vmul.f32 -1.442695, %v2155_v33  ;;  %v2147_v39 = vadd.f32 %v4109_v57, %v2146_v36 }
 0x507   : > { %v3468_v40 = vpop.eup %3467  ;;  %3483 = vpow2.f32 %v2897_v32  ;;  %v3301_v41 = vpop.f32.mrf.mxu1 }
 0x508   : > { %3485 = vrcp.f32 %v2337_v37  ;;  %v2335_v42 = vadd.f32 1.0, %v3468_v40  ;;  %v2898_v43 = vmul.f32 -1.442695, %v2147_v39  ;;  %v2168_v44 = vadd.f32 %v3301_v41, %v4109_v57 }
 0x509   : > { %v3470_v45 = vpop.eup %3469  ;;  %3487 = vpow2.f32 %v2900_v38  ;;  %v2159_v46 = vpop.f32.mrf.mxu1 }
 0x50a   : > { %3489 = vrcp.f32 %v2335_v42  ;;  %v2340_v47 = vadd.f32 1.0, %v3470_v45  ;;  %v2903_v48 = vmul.f32 -1.442695, %v2168_v44  ;;  %v2160_v49 = vadd.f32 %v4109_v57, %v2159_v46 }
 0x50b   : > { %v3472_v50 = vpop.eup %3471  ;;  %3491 = vpow2.f32 %v2898_v43  ;;  %v3302_v51 = vpop.f32.mrf.mxu1 }
 0x50c   : > { %3493 = vrcp.f32 %v2340_v47  ;;  %v2338_v52 = vadd.f32 1.0, %v3472_v50  ;;  %v2901_v53 = vmul.f32 -1.442695, %v2160_v49  ;;  %v2171_v54 = vadd.f32 %v3302_v51, %v4109_v57 }
 0x50d   : > { %v3474_v55 = vpop.eup %3473  ;;  %3495 = vpow2.f32 %v2903_v48  ;;  %v2162_v56 = vpop.f32.mrf.mxu1 }
 0x50e   : > { %3497 = vrcp.f32 %v2338_v52  ;;  %v2341_v11 = vadd.f32 1.0, %v3474_v55  ;;  %v2904_v58 = vmul.f32 -1.442695, %v2171_v54  ;;  %v2163_v62 = vadd.f32 %v4109_v57, %v2162_v56 }
 0x50f   : > { %v3476_v0 = vpop.eup %3475  ;;  %3499 = vpow2.f32 %v2901_v53  ;;  %v3305_v1 = vpop.f32.mrf.mxu1 }
 0x510   : > { %3501 = vrcp.f32 %v2341_v11  ;;  %v2339_v4 = vadd.f32 1.0, %v3476_v0  ;;  %v2902_v2 = vmul.f32 -1.442695, %v2163_v62  ;;  %v2184_v3 = vadd.f32 %v3305_v1, %v4109_v57 }
 0x511   : > { %v4128_v24 = vpop.eup %3477  ;;  %3503 = vpow2.f32 %v2904_v58  ;;  %v2175_v8 = vpop.f32.mrf.mxu1 }
 0x512   : > { %v3480_v9 = vpop.eup %3479  ;;  %3505 = vrcp.f32 %v2339_v4  ;;  %v2907_v10 = vmul.f32 -1.442695, %v2184_v3  ;;  %v2176_v12 = vadd.f32 %v4109_v57, %v2175_v8  ;;  %2434 = vrot.lane.b32.xlu1 %v4128_v24, %s3598_s28 }
 0x513   : > { %v4133_v13 = vpop.eup %3481  ;;  %v2344_v5 = vadd.f32 1.0, %v3480_v9  ;;  %3507 = vpow2.f32 %v2902_v2  ;;  %v3306_v14 = vpop.f32.mrf.mxu1 }
 0x514   : > { %v3484_v15 = vpop.eup %3483  ;;  %3509 = vpow2.f32 %v2907_v10  ;;  %v2905_v6 = vmul.f32 -1.442695, %v2176_v12  ;;  %v2187_v16 = vadd.f32 %v3306_v14, %v4109_v57  ;;  %2430 = vrot.lane.b32.xlu0 %v4133_v13, %s3598_s28 }
 0x515   : > { %v4138_v17 = vpop.eup %3485  ;;  %3511 = vrcp.f32 %v2344_v5  ;;  %v2342_v18 = vadd.f32 1.0, %v3484_v15  ;;  %v2178_v19 = vpop.f32.mrf.mxu1 }
 0x516   : > { %v3488_v34 = vpop.eup %3487  ;;  %3513 = vpow2.f32 %v2905_v6  ;;  %v2908_v20 = vmul.f32 -1.442695, %v2187_v16  ;;  %v2179_v21 = vadd.f32 %v4109_v57, %v2178_v19  ;;  %2436 = vrot.lane.b32.xlu1 %v4138_v17, %s3598_s28 }
 0x517   : > { %v4143_v22 = vpop.eup %3489  ;;  %3515 = vrcp.f32 %v2342_v18  ;;  %v2345_v23 = vadd.f32 1.0, %v3488_v34  ;;  %v3309_v25 = vpop.f32.mrf.mxu1 }
 0x518   : > { %v3492_v26 = vpop.eup %3491  ;;  %3517 = vpow2.f32 %v2908_v20  ;;  %v2906_v27 = vmul.f32 -1.442695, %v2179_v21  ;;  %v2200_v7 = vadd.f32 %v3309_v25, %v4109_v57  ;;  %2432 = vrot.lane.b32.xlu0 %v4143_v22, %s3598_s28 }
 0x519   : > { %v4148_v28 = vpop.eup %3493  ;;  %3519 = vrcp.f32 %v2345_v23  ;;  %v2343_v29 = vadd.f32 1.0, %v3492_v26  ;;  %v2191_v30 = vpop.f32.mrf.mxu1 }
 0x51a   : > { %v3496_v31 = vpop.eup %3495  ;;  %3521 = vpow2.f32 %v2906_v27  ;;  %v2911_v32 = vmul.f32 -1.442695, %v2200_v7  ;;  %v2192_v33 = vadd.f32 %v4109_v57, %v2191_v30 }
 0x51b   : > { %v4151_v35 = vpop.eup %3497  ;;  %3523 = vrcp.f32 %v2343_v29  ;;  %v2348_v36 = vadd.f32 1.0, %v3496_v31  ;;  %v3310_v37 = vpop.f32.mrf.mxu1 }
 0x51c   : > { %v3500_v38 = vpop.eup %3499  ;;  %3525 = vpow2.f32 %v2911_v32  ;;  %v2909_v39 = vmul.f32 -1.442695, %v2192_v33  ;;  %v2203_v40 = vadd.f32 %v3310_v37, %v4109_v57  ;;  %2442 = vrot.lane.b32.xlu0 %v4148_v28, %s3598_s28 }
 0x51d   : > { %v4156_v41 = vpop.eup %3501  ;;  %3527 = vrcp.f32 %v2348_v36  ;;  %v2346_v42 = vadd.f32 1.0, %v3500_v38  ;;  %v2194_v43 = vpop.f32.mrf.mxu1 }
 0x51e   : > { %v3504_v44 = vpop.eup %3503  ;;  %3529 = vpow2.f32 %v2909_v39  ;;  %v2912_v45 = vmul.f32 -1.442695, %v2203_v40  ;;  %v2195_v46 = vadd.f32 %v4109_v57, %v2194_v43  ;;  %2444 = vrot.lane.b32.xlu1 %v4156_v41, %s3598_s28 }
 0x51f   : > { %v4161_v47 = vpop.eup %3505  ;;  %3531 = vrcp.f32 %v2346_v42  ;;  %v2349_v48 = vadd.f32 1.0, %v3504_v44  ;;  %v3313_v49 = vpop.f32.mrf.mxu1 }
 0x520   : > { %v3508_v50 = vpop.eup %3507  ;;  %3533 = vpow2.f32 %v2912_v45  ;;  %v2910_v51 = vmul.f32 -1.442695, %v2195_v46  ;;  %v2216_v52 = vadd.f32 %v3313_v49, %v4109_v57  ;;  %2438 = vrot.lane.b32.xlu0 %v4151_v35, %s3598_s28 }
 0x521   : > { %v3510_v53 = vpop.eup %3509  ;;  %3535 = vrcp.f32 %v2349_v48  ;;  %v2347_v54 = vadd.f32 1.0, %v3508_v50  ;;  %v2207_v55 = vpop.f32.mrf.mxu1 }
 0x522   : > { %v4166_v56 = vpop.eup %3511  ;;  %v2352_v11 = vadd.f32 1.0, %v3510_v53  ;;  %3537 = vpow2.f32 %v2910_v51  ;;  %v2915_v58 = vmul.f32 -1.442695, %v2216_v52  ;;  %v2208_v62 = vadd.f32 %v4109_v57, %v2207_v55  ;;  %2440 = vrot.lane.b32.xlu1 %v4161_v47, %s3598_s28  ;;  %v4207_v51 = vpop.permute.xlu1 %2596 }
 0x523   : > { %v3514_v0 = vpop.eup %3513  ;;  %3539 = vrcp.f32 %v2347_v54  ;;  %v3314_v1 = vpop.f32.mrf.mxu1 }
 0x524   : > { %v4171_v4 = vpop.eup %3515  ;;  %3541 = vrcp.f32 %v2352_v11  ;;  %v2350_v2 = vadd.f32 1.0, %v3514_v0  ;;  %v2913_v3 = vmul.f32 -1.442695, %v2208_v62  ;;  %v2219_v8 = vadd.f32 %v3314_v1, %v4109_v57  ;;  %2450 = vrot.lane.b32.xlu0 %v4166_v56, %s3598_s28  ;;  %v4213_v54 = vpop.permute.xlu0 %2594 }
 0x525   : > { %v3518_v9 = vpop.eup %3517  ;;  %3543 = vpow2.f32 %v2915_v58  ;;  %v2210_v10 = vpop.f32.mrf.mxu1 }
 0x526   : > { %v4176_v12 = vpop.eup %3519  ;;  %3545 = vrcp.f32 %v2350_v2  ;;  %v2353_v5 = vadd.f32 1.0, %v3518_v9  ;;  %v2916_v14 = vmul.f32 -1.442695, %v2219_v8  ;;  %v2211_v15 = vadd.f32 %v4109_v57, %v2210_v10  ;;  %v4223_v2 = vpop.permute.xlu1 %2592 }
 0x527   : > { %v3522_v6 = vpop.eup %3521  ;;  %3547 = vpow2.f32 %v2913_v3  ;;  %2452 = vrot.lane.b32.xlu1 %v4176_v12, %s3598_s28  ;;  %v3317_v16 = vpop.f32.mrf.mxu1 }
 0x528   : > { %v4181_v18 = vpop.eup %3523  ;;  %3549 = vrcp.f32 %v2353_v5  ;;  %v2351_v19 = vadd.f32 1.0, %v3522_v6  ;;  %v2914_v34 = vmul.f32 -1.442695, %v2211_v15  ;;  %v2232_v20 = vadd.f32 %v3317_v16, %v4109_v57  ;;  %2446 = vrot.lane.b32.xlu0 %v4171_v4, %s3598_s28  ;;  %v4229_v10 = vpop.permute.xlu0 %2590 }
 0x529   : > { %v3526_v21 = vpop.eup %3525  ;;  %3551 = vpow2.f32 %v2916_v14  ;;  %v2223_v23 = vpop.f32.mrf.mxu1 }
 0x52a   : > { %v4186_v25 = vpop.eup %3527  ;;  %3553 = vrcp.f32 %v2351_v19  ;;  %v2356_v26 = vadd.f32 1.0, %v3526_v21  ;;  %v2919_v27 = vmul.f32 -1.442695, %v2232_v20  ;;  %v2224_v7 = vadd.f32 %v4109_v57, %v2223_v23  ;;  %v4237_v16 = vpop.permute.xlu1 %2604 }
 0x52b   : > { %v3530_v29 = vpop.eup %3529  ;;  %3555 = vpow2.f32 %v2914_v34  ;;  %2448 = vrot.lane.b32.xlu1 %v4181_v18, %s3598_s28  ;;  %v3318_v30 = vpop.f32.mrf.mxu1 }
 0x52c   : > { %v4191_v31 = vpop.eup %3531  ;;  %3557 = vrcp.f32 %v2356_v26  ;;  %v2917_v32 = vmul.f32 -1.442695, %v2224_v7  ;;  %v2235_v33 = vadd.f32 %v3318_v30, %v4109_v57  ;;  %2458 = vrot.lane.b32.xlu0 %v4186_v25, %s3598_s28  ;;  %v2354_v39 = vadd.f32 1.0, %v3530_v29  ;;  %v4243_v23 = vpop.permute.xlu0 %2602 }
 0x52d   : > { %v3534_v36 = vpop.eup %3533  ;;  %3559 = vpow2.f32 %v2919_v27  ;;  %v2226_v37 = vpop.f32.mrf.mxu1 }
 0x52e   : > { %v4196_v38 = vpop.eup %3535  ;;  %v2357_v40 = vadd.f32 1.0, %v3534_v36  ;;  %v2920_v42 = vmul.f32 -1.442695, %v2235_v33  ;;  %v2227_v43 = vadd.f32 %v4109_v57, %v2226_v37  ;;  %3561 = vpow2.f32 %v2917_v32  ;;  %v4253_v29 = vpop.permute.xlu1 %2600 }
 0x52f   : > { %v3538_v44 = vpop.eup %3537  ;;  %2460 = vrot.lane.b32.xlu1 %v4196_v38, %s3598_s28 }
 0x530   : > { %v4201_v45 = vpop.eup %3539  ;;  %3563 = vrcp.f32 %v2357_v40  ;;  %v2918_v46 = vmul.f32 -1.442695, %v2227_v43  ;;  %2454 = vrot.lane.b32.xlu0 %v4191_v31, %s3598_s28  ;;  %v2355_v49 = vadd.f32 1.0, %v3538_v44  ;;  %v4259_v32 = vpop.permute.xlu0 %2598 }
 0x531   : > { %v4205_v48 = vpop.eup %3541  ;;  %3565 = vpow2.f32 %v2920_v42 }
 0x532   : > { %v3544_v50 = vpop.eup %3543  ;;  %3567 = vrcp.f32 %v2354_v39  ;;  %v4269_v37 = vpop.permute.xlu1 %2612 }
 0x533   : > { %v4209_v57 = vpop.eup %3545  ;;  %v2360_v52 = vadd.f32 1.0, %v3544_v50  ;;  %3569 = vpow2.f32 %v2918_v46  ;;  %2456 = vrot.lane.b32.xlu1 %v4201_v45, %s3598_s28 }
 0x534   : > { %v3548_v53 = vpop.eup %3547  ;;  %2466 = vrot.lane.b32.xlu0 %v4205_v48, %s3598_s28  ;;  %3571 = vrcp.f32 %v2355_v49  ;;  %v4275_v40 = vpop.permute.xlu0 %2610 }
 0x535   : > { %v4217_v55 = vpop.eup %3549  ;;  %3573 = vrcp.f32 %v2360_v52  ;;  %v2358_v58 = vadd.f32 1.0, %v3548_v53 }
 0x536   : > { %v3552_v11 = vpop.eup %3551  ;;  %v4285_v44 = vpop.permute.xlu1 %2608 }
 0x537   : > { %v4219_v62 = vpop.eup %3553  ;;  %v2361_v0 = vadd.f32 1.0, %v3552_v11  ;;  %2468 = vrot.lane.b32.xlu1 %v4217_v55, %s3598_s28 }
 0x538   : > { %v3556_v1 = vpop.eup %3555  ;;  %2462 = vrot.lane.b32.xlu0 %v4209_v57, %s3598_s28  ;;  %v4291_v49 = vpop.permute.xlu0 %2606 }
 0x539   : > { %v4227_v3 = vpop.eup %3557  ;;  %3575 = vrcp.f32 %v2361_v0  ;;  %v2359_v8 = vadd.f32 1.0, %v3556_v1 }
 0x53a   : > { %v3560_v9 = vpop.eup %3559  ;;  %3577 = vrcp.f32 %v2358_v58  ;;  %v4297_v50 = vpop.permute.xlu1 %2620 }
 0x53b   : > { %v2364_v5 = vadd.f32 1.0, %v3560_v9  ;;  %2464 = vrot.lane.b32.xlu1 %v4219_v62, %s3598_s28  ;;  %v3562_v14 = vpop.eup %3561  ;;  %3579 = vrcp.f32 %v2359_v8 }
 0x53c   : > { %2474 = vrot.lane.b32.xlu0 %v4227_v3, %s3598_s28  ;;  %v2362_v19 = vadd.f32 1.0, %v3562_v14  ;;  %v4301_v52 = vpop.permute.xlu0 %2618 }
 0x53d   : > { %v4235_v15 = vpop.eup %3563  ;;  %3581 = vrcp.f32 %v2364_v5 }
 0x53e   : > { %v3566_v6 = vpop.eup %3565  ;;  %v4307_v53 = vpop.permute.xlu1 %2616 }
 0x53f   : > { %v4239_v34 = vpop.eup %3567  ;;  %v2365_v20 = vadd.f32 1.0, %v3566_v6  ;;  %2476 = vrot.lane.b32.xlu1 %v4235_v15, %s3598_s28 }
 0x540   : > { %v3570_v21 = vpop.eup %3569  ;;  %2470 = vrot.lane.b32.xlu0 %v4239_v34, %s3598_s28  ;;  %v4309_v11 = vpop.permute.xlu0 %2614 }
 0x541   : > { %3583 = vrcp.f32 %v2365_v20  ;;  %v2363_v26 = vadd.f32 1.0, %v3570_v21  ;;  %v4247_v27 = vpop.eup %3571 }
 0x542   : > { %3585 = vrcp.f32 %v2362_v19  ;;  %v4249_v7 = vpop.eup %3573  ;;  %v4311_v58 = vpop.permute.xlu1 %2628 }
 0x543   : > { %2472 = vrot.lane.b32.xlu1 %v4247_v27, %s3598_s28  ;;  %3587 = vrcp.f32 %v2363_v26 }
 0x544   : > { %2482 = vrot.lane.b32.xlu0 %v4249_v7, %s3598_s28 }
 0x546   : > { %v4257_v30 = vpop.eup %3575  ;;  %v4315_v0 = vpop.permute.xlu1 %2624 }
 0x547   : > { %v4261_v33 = vpop.eup %3577  ;;  %2484 = vrot.lane.b32.xlu1 %v4257_v30, %s3598_s28 }
 0x548   : > { %2478 = vrot.lane.b32.xlu0 %v4261_v33, %s3598_s28  ;;  %v4267_v36 = vpop.eup %3579 }
 0x549   : > { %4492 = vst [vmem:[#allocation2_spill] sm:$0xff] %v4267_v36 }
 0x54a   : > { %v4271_v39 = vpop.eup %3581  ;;  %v4319_v1 = vpop.permute.xlu1 %2636 }
 0x54b   : > { %4493 = vst [vmem:[#allocation3_spill] sm:$0xff] %v4271_v39  ;;  %2480 = vrot.lane.b32.xlu1 %v4267_v36, %s3598_s28 }
 0x54c   : > { %2490 = vrot.lane.b32.xlu0 %v4271_v39, %s3598_s28 }
 0x54e   : > { %v4279_v42 = vpop.eup %3583 }
 0x54f   : > { %4494 = vst [vmem:[#allocation4_spill] sm:$0xff] %v4279_v42  ;;  %v4281_v43 = vpop.eup %3585  ;;  %2492 = vrot.lane.b32.xlu1 %v4279_v42, %s3598_s28 }
 0x550   : > { %4495 = vst [vmem:[#allocation5_spill] sm:$0xff] %v4281_v43  ;;  %2486 = vrot.lane.b32.xlu0 %v4281_v43, %s3598_s28  ;;  %v4289_v46 = vpop.eup %3587 }
 0x551   : > { %4496 = vst [vmem:[#allocation6_spill] sm:$0xff] %v4289_v46 }
 0x553   : > { %2488 = vrot.lane.b32.xlu1 %v4289_v46, %s3598_s28 }
 0x554   : > { %2646 = vrot.lane.b32.xlu0 %v3956_v59, %s3597_s24  ;;  %v4313_v59 = vpop.permute.xlu0 %2626 }
 0x557   : > { %2648 = vrot.lane.b32.xlu1 %v3960_v61, %s3597_s24 }
 0x558   : > { %2650 = vrot.lane.b32.xlu0 %v3964_v63, %s3597_s24  ;;  %v4317_v61 = vpop.permute.xlu0 %2622  ;;  %v4323_v63 = vpop.permute.xlu1 %2632 }
 0x55b   : > { %2652 = vrot.lane.b32.xlu1 %v3958_v60, %s3597_s24  ;;  %s2782_s24 = sshll.u32 %s4511_s29, 3 }
 0x55c   : > { %v4321_v8 = vpop.permute.xlu0 %2634  ;;  %v4327_v9 = vpop.permute.xlu1 %2644  ;;  %s4343_s15 = scalar_lea.vmem %s4481_s13, %s2782_s24 }
 0x55d   : > { %4497 = vst [vmem:[#allocation7_spill] sm:$0xff] %v4327_v9 }
 0x560   : > { %v4325_v60 = vpop.permute.xlu0 %2630  ;;  %v4331_v14 = vpop.permute.xlu1 %2640 }
 0x561   : > { %4499 = vst [vmem:[#allocation9_spill] sm:$0xff] %v4331_v14 }
 0x564   : > { %v4329_v5 = vpop.permute.xlu0 %2642 }
 0x565   : > { %4498 = vst [vmem:[#allocation8_spill] sm:$0xff] %v4329_v5 }
 0x568   : > { %v4333_v6 = vpop.permute.xlu0 %2638 }
 0x569   : > { %4500 = vst [vmem:[#allocation10_spill] sm:$0xff] %v4333_v6 }
 0x584   : > { %v2435_v19 = vpop.permute.xlu1 %2434 }
 0x585   : > { %v2496_v20 = vmul.f32 %v4128_v24, %v2435_v19 }
 0x586   : > { %v2431_v21 = vpop.permute.xlu0 %2430 }
 0x587   : > { %v2528_v26 = vsub.f32 1.0, %v2496_v20  ;;  %v2494_v46 = vmul.f32 %v4133_v13, %v2431_v21 }
 0x588   : > { %v2437_v42 = vpop.permute.xlu1 %2436 }
 0x589   : > { %v2560_v43 = vmul.f32 %v4128_v24, %v2528_v26  ;;  %v2526_v39 = vsub.f32 1.0, %v2494_v46  ;;  %v2497_v9 = vmul.f32 %v4138_v17, %v2437_v42 }
 0x58a   : > { %v2433_v19 = vpop.permute.xlu0 %2432 }
 0x58b   : > { %v2656_v14 = vadd.f32 %v4213_v54, %v2560_v43  ;;  %v2558_v20 = vmul.f32 %v4133_v13, %v2526_v39  ;;  %v2529_v21 = vsub.f32 1.0, %v2497_v9  ;;  %v2495_v6 = vmul.f32 %v4143_v22, %v2433_v19 }
 0x58d   : > { %2688 = vst [vmem:[%s4343_s15 + $0x10] sm:$0xff] %v2656_v14  ;;  %v2654_v24 = vadd.f32 %v4229_v10, %v2558_v20  ;;  %v2561_v42 = vmul.f32 %v4138_v17, %v2529_v21  ;;  %v2527_v46 = vsub.f32 1.0, %v2495_v6 }
 0x58e   : > { %v2443_v26 = vpop.permute.xlu0 %2442 }
 0x58f   : > { %2686 = vst [vmem:[%s4343_s15] sm:$0xff] %v2654_v24  ;;  %v2657_v36 = vadd.f32 %v4207_v51, %v2561_v42  ;;  %v2559_v5 = vmul.f32 %v4143_v22, %v2527_v46  ;;  %v2500_v54 = vmul.f32 %v4148_v28, %v2443_v26 }
 0x590   : > { %v2445_v43 = vpop.permute.xlu1 %2444 }
 0x591   : > { %2689 = vst [vmem:[%s4343_s15 + $0x18] sm:$0xff] %v2657_v36  ;;  %v2655_v13 = vadd.f32 %v4223_v2, %v2559_v5  ;;  %v2532_v39 = vsub.f32 1.0, %v2500_v54  ;;  %v2501_v9 = vmul.f32 %v4156_v41, %v2445_v43 }
 0x592   : > { %v2439_v10 = vpop.permute.xlu0 %2438 }
 0x593   : > { %2687 = vst [vmem:[%s4343_s15 + $0x8] sm:$0xff] %v2655_v13  ;;  %v2564_v17 = vmul.f32 %v4148_v28, %v2532_v39  ;;  %v2533_v14 = vsub.f32 1.0, %v2501_v9  ;;  %v2498_v51 = vmul.f32 %v4151_v35, %v2439_v10 }
 0x594   : > { %v2441_v6 = vpop.permute.xlu1 %2440 }
 0x595   : > { %v2660_v22 = vadd.f32 %v4243_v23, %v2564_v17  ;;  %v2565_v19 = vmul.f32 %v4156_v41, %v2533_v14  ;;  %v2530_v36 = vsub.f32 1.0, %v2498_v51  ;;  %v2499_v2 = vmul.f32 %v4161_v47, %v2441_v6 }
 0x596   : > { %v2451_v5 = vpop.permute.xlu0 %2450 }
 0x597   : > { %2692 = vst [vmem:[%s4343_s15 + $0x30] sm:$0xff] %v2660_v22  ;;  %v2661_v20 = vadd.f32 %v4237_v16, %v2565_v19  ;;  %v2562_v21 = vmul.f32 %v4151_v35, %v2530_v36  ;;  %v2531_v28 = vsub.f32 1.0, %v2499_v2  ;;  %v2504_v24 = vmul.f32 %v4166_v56, %v2451_v5 }
 0x599   : > { %2693 = vst [vmem:[%s4343_s15 + $0x38] sm:$0xff] %v2661_v20  ;;  %v2658_v42 = vadd.f32 %v4259_v32, %v2562_v21  ;;  %v2563_v23 = vmul.f32 %v4161_v47, %v2531_v28  ;;  %v2536_v41 = vsub.f32 1.0, %v2504_v24  ;;  %v2453_v46 = vpop.permute.xlu1 %2452 }
 0x59a   : > { %v2505_v26 = vmul.f32 %v4176_v12, %v2453_v46  ;;  %v2447_v54 = vpop.permute.xlu0 %2446 }
 0x59b   : > { %2690 = vst [vmem:[%s4343_s15 + $0x20] sm:$0xff] %v2658_v42  ;;  %v2659_v16 = vadd.f32 %v4253_v29, %v2563_v23  ;;  %v2568_v43 = vmul.f32 %v4166_v56, %v2536_v41  ;;  %v2502_v35 = vmul.f32 %v4171_v4, %v2447_v54 }
 0x59c   : > { %v2537_v13 = vsub.f32 1.0, %v2505_v26 }
 0x59d   : > { %2691 = vst [vmem:[%s4343_s15 + $0x28] sm:$0xff] %v2659_v16  ;;  %v2664_v32 = vadd.f32 %v4275_v40, %v2568_v43  ;;  %v2534_v39 = vsub.f32 1.0, %v2502_v35  ;;  %v2449_v47 = vpop.permute.xlu1 %2448 }
 0x59e   : > { %v2569_v9 = vmul.f32 %v4176_v12, %v2537_v13  ;;  %v2503_v10 = vmul.f32 %v4181_v18, %v2449_v47  ;;  %v2459_v17 = vpop.permute.xlu0 %2458 }
 0x59f   : > { %2696 = vst [vmem:[%s4343_s15 + $0x50] sm:$0xff] %v2664_v32  ;;  %v2566_v29 = vmul.f32 %v4171_v4, %v2534_v39  ;;  %v2508_v56 = vmul.f32 %v4186_v25, %v2459_v17 }
 0x5a0   : > { %v2665_v14 = vadd.f32 %v4269_v37, %v2569_v9  ;;  %v2535_v51 = vsub.f32 1.0, %v2503_v10 }
 0x5a1   : > { %v2662_v6 = vadd.f32 %v4291_v49, %v2566_v29  ;;  %v2540_v40 = vsub.f32 1.0, %v2508_v56  ;;  %v2461_v22 = vpop.permute.xlu1 %2460 }
 0x5a2   : > { %2697 = vst [vmem:[%s4343_s15 + $0x58] sm:$0xff] %v2665_v14  ;;  %v2567_v12 = vmul.f32 %v4181_v18, %v2535_v51  ;;  %v2509_v19 = vmul.f32 %v4196_v38, %v2461_v22  ;;  %v2455_v36 = vpop.permute.xlu0 %2454 }
 0x5a3   : > { %2694 = vst [vmem:[%s4343_s15 + $0x40] sm:$0xff] %v2662_v6  ;;  %v2572_v4 = vmul.f32 %v4186_v25, %v2540_v40  ;;  %v2506_v2 = vmul.f32 %v4191_v31, %v2455_v36 }
 0x5a4   : > { %v2663_v37 = vadd.f32 %v4285_v44, %v2567_v12  ;;  %v2541_v5 = vsub.f32 1.0, %v2509_v19 }
 0x5a5   : > { %v2668_v49 = vadd.f32 %v4301_v52, %v2572_v4  ;;  %v2538_v20 = vsub.f32 1.0, %v2506_v2  ;;  %v2457_v21 = vpop.permute.xlu1 %2456 }
 0x5a6   : > { %2695 = vst [vmem:[%s4343_s15 + $0x48] sm:$0xff] %v2663_v37  ;;  %v2573_v18 = vmul.f32 %v4196_v38, %v2541_v5  ;;  %v2507_v28 = vmul.f32 %v4201_v45, %v2457_v21  ;;  %v2467_v24 = vpop.permute.xlu0 %2466  ;;  %v4501_v21 = vld [vmem:[#allocation8_spill] sm:$0xff] }
 0x5a7   : > { %2700 = vst [vmem:[%s4343_s15 + $0x70] sm:$0xff] %v2668_v49  ;;  %v2570_v25 = vmul.f32 %v4191_v31, %v2538_v20  ;;  %v2512_v42 = vmul.f32 %v4205_v48, %v2467_v24  ;;  %v4502_v24 = vld [vmem:[#allocation2_spill] sm:$0xff] }
 0x5a8   : > { %v2669_v44 = vadd.f32 %v4297_v50, %v2573_v18  ;;  %v2539_v23 = vsub.f32 1.0, %v2507_v28 }
 0x5a9   : > { %v2666_v52 = vadd.f32 %v4309_v11, %v2570_v25  ;;  %v2544_v41 = vsub.f32 1.0, %v2512_v42  ;;  %v2469_v46 = vpop.permute.xlu1 %2468 }
 0x5aa   : > { %2701 = vst [vmem:[%s4343_s15 + $0x78] sm:$0xff] %v2669_v44  ;;  %v2571_v38 = vmul.f32 %v4201_v45, %v2539_v23  ;;  %v2513_v26 = vmul.f32 %v4217_v55, %v2469_v46  ;;  %v2463_v54 = vpop.permute.xlu0 %2462  ;;  %v4503_v44 = vld [vmem:[#allocation7_spill] sm:$0xff] }
 0x5ab   : > { %2698 = vst [vmem:[%s4343_s15 + $0x60] sm:$0xff] %v2666_v52  ;;  %v2576_v31 = vmul.f32 %v4205_v48, %v2544_v41  ;;  %v2510_v16 = vmul.f32 %v4209_v57, %v2463_v54  ;;  %v4504_v52 = vld [vmem:[#allocation10_spill] sm:$0xff]  ;;  %v4505_v46 = vld [vmem:[#allocation3_spill] sm:$0xff] }
 0x5ac   : > { %v2667_v50 = vadd.f32 %v4307_v53, %v2571_v38  ;;  %v2545_v43 = vsub.f32 1.0, %v2513_v26 }
 0x5ad   : > { %v2672_v11 = vadd.f32 %v4313_v59, %v2576_v31  ;;  %v2542_v35 = vsub.f32 1.0, %v2510_v16  ;;  %v2465_v13 = vpop.permute.xlu1 %2464 }
 0x5ae   : > { %2699 = vst [vmem:[%s4343_s15 + $0x68] sm:$0xff] %v2667_v50  ;;  %v2577_v45 = vmul.f32 %v4217_v55, %v2545_v43  ;;  %v2511_v32 = vmul.f32 %v4219_v62, %v2465_v13  ;;  %v2475_v39 = vpop.permute.xlu0 %2474  ;;  %v4507_v50 = vld [vmem:[#allocation9_spill] sm:$0xff] }
 0x5af   : > { %2704 = vst [vmem:[%s4343_s15 + $0x90] sm:$0xff] %v2672_v11  ;;  %v2574_v48 = vmul.f32 %v4209_v57, %v2542_v35  ;;  %v2516_v47 = vmul.f32 %v4227_v3, %v2475_v39  ;;  %v4508_v11 = vld [vmem:[#allocation4_spill] sm:$0xff] }
 0x5b0   : > { %v2673_v53 = vadd.f32 %v4311_v58, %v2577_v45  ;;  %v2543_v9 = vsub.f32 1.0, %v2511_v32  ;;  %v4509_v32 = vld [vmem:[#allocation6_spill] sm:$0xff] }
 0x5b1   : > { %v2670_v59 = vadd.f32 %v4317_v61, %v2574_v48  ;;  %v2548_v10 = vsub.f32 1.0, %v2516_v47  ;;  %v2477_v17 = vpop.permute.xlu1 %2476 }
 0x5b2   : > { %2705 = vst [vmem:[%s4343_s15 + $0x98] sm:$0xff] %v2673_v53  ;;  %v2575_v55 = vmul.f32 %v4219_v62, %v2543_v9  ;;  %v2517_v29 = vmul.f32 %v4235_v15, %v2477_v17  ;;  %v2471_v56 = vpop.permute.xlu0 %2470 }
 0x5b3   : > { %2702 = vst [vmem:[%s4343_s15 + $0x80] sm:$0xff] %v2670_v59  ;;  %v2580_v57 = vmul.f32 %v4227_v3, %v2548_v10  ;;  %v2514_v14 = vmul.f32 %v4239_v34, %v2471_v56 }
 0x5b4   : > { %v2671_v58 = vadd.f32 %v4315_v0, %v2575_v55  ;;  %v2549_v51 = vsub.f32 1.0, %v2517_v29 }
 0x5b5   : > { %v2676_v61 = vadd.f32 %v4321_v8, %v2580_v57  ;;  %v2546_v6 = vsub.f32 1.0, %v2514_v14  ;;  %v2473_v40 = vpop.permute.xlu1 %2472 }
 0x5b6   : > { %2703 = vst [vmem:[%s4343_s15 + $0x88] sm:$0xff] %v2671_v58  ;;  %v2581_v62 = vmul.f32 %v4235_v15, %v2549_v51  ;;  %v2515_v22 = vmul.f32 %v4247_v27, %v2473_v40  ;;  %v2483_v12 = vpop.permute.xlu0 %2482 }
 0x5b7   : > { %2708 = vst [vmem:[%s4343_s15 + $0xb0] sm:$0xff] %v2676_v61  ;;  %v2578_v3 = vmul.f32 %v4239_v34, %v2546_v6  ;;  %v2520_v19 = vmul.f32 %v4249_v7, %v2483_v12 }
 0x5b8   : > { %v2677_v0 = vadd.f32 %v4319_v1, %v2581_v62  ;;  %v2547_v36 = vsub.f32 1.0, %v2515_v22 }
 0x5b9   : > { %v2674_v8 = vadd.f32 %v4325_v60, %v2578_v3  ;;  %v2552_v4 = vsub.f32 1.0, %v2520_v19  ;;  %v2485_v2 = vpop.permute.xlu1 %2484 }
 0x5ba   : > { %2709 = vst [vmem:[%s4343_s15 + $0xb8] sm:$0xff] %v2677_v0  ;;  %v2579_v15 = vmul.f32 %v4247_v27, %v2547_v36  ;;  %v2521_v37 = vmul.f32 %v4257_v30, %v2485_v2  ;;  %v2479_v5 = vpop.permute.xlu0 %2478 }
 0x5bb   : > { %2706 = vst [vmem:[%s4343_s15 + $0xa0] sm:$0xff] %v2674_v8  ;;  %v2584_v34 = vmul.f32 %v4249_v7, %v2552_v4  ;;  %v2518_v49 = vmul.f32 %v4261_v33, %v2479_v5 }
 0x5bc   : > { %v2675_v1 = vadd.f32 %v4323_v63, %v2579_v15  ;;  %v2553_v20 = vsub.f32 1.0, %v2521_v37 }
 0x5bd   : > { %v2680_v60 = vadd.f32 %v4501_v21, %v2584_v34  ;;  %v2550_v18 = vsub.f32 1.0, %v2518_v49  ;;  %v2481_v28 = vpop.permute.xlu1 %2480 }
 0x5be   : > { %2707 = vst [vmem:[%s4343_s15 + $0xa8] sm:$0xff] %v2675_v1  ;;  %v2585_v27 = vmul.f32 %v4257_v30, %v2553_v20  ;;  %v2519_v25 = vmul.f32 %v4502_v24, %v2481_v28  ;;  %v2491_v42 = vpop.permute.xlu0 %2490  ;;  %v4506_v30 = vld [vmem:[#allocation5_spill] sm:$0xff] }
 0x5bf   : > { %2712 = vst [vmem:[%s4343_s15 + $0xd0] sm:$0xff] %v2680_v60  ;;  %v2582_v7 = vmul.f32 %v4261_v33, %v2550_v18  ;;  %v2524_v38 = vmul.f32 %v4505_v46, %v2491_v42 }
 0x5c0   : > { %v2681_v23 = vadd.f32 %v4503_v44, %v2585_v27  ;;  %v2551_v63 = vsub.f32 1.0, %v2519_v25 }
 0x5c1   : > { %v2678_v41 = vadd.f32 %v4504_v52, %v2582_v7  ;;  %v2493_v26 = vpop.permute.xlu1 %2492  ;;  %v2556_v35 = vsub.f32 1.0, %v2524_v38 }
 0x5c2   : > { %2713 = vst [vmem:[%s4343_s15 + $0xd8] sm:$0xff] %v2681_v23  ;;  %v2583_v54 = vmul.f32 %v4502_v24, %v2551_v63  ;;  %v2487_v31 = vpop.permute.xlu0 %2486  ;;  %v2525_v33 = vmul.f32 %v4508_v11, %v2493_v26 }
 0x5c3   : > { %2710 = vst [vmem:[%s4343_s15 + $0xc0] sm:$0xff] %v2678_v41  ;;  %v2522_v16 = vmul.f32 %v4506_v30, %v2487_v31  ;;  %v2588_v17 = vmul.f32 %v4505_v46, %v2556_v35 }
 0x5c4   : > { %v2679_v43 = vadd.f32 %v4507_v50, %v2583_v54  ;;  %v2557_v53 = vsub.f32 1.0, %v2525_v33 }
 0x5c5   : > { %v2554_v13 = vsub.f32 1.0, %v2522_v16  ;;  %v2489_v45 = vpop.permute.xlu1 %2488 }
 0x5c6   : > { %2711 = vst [vmem:[%s4343_s15 + $0xc8] sm:$0xff] %v2679_v43  ;;  %v2523_v39 = vmul.f32 %v4509_v32, %v2489_v45  ;;  %v2647_v48 = vpop.permute.xlu0 %2646  ;;  %v2589_v14 = vmul.f32 %v4508_v11, %v2557_v53 }
 0x5c7   : > { %v2586_v47 = vmul.f32 %v4506_v30, %v2554_v13 }
 0x5c8   : > { %v2555_v9 = vsub.f32 1.0, %v2523_v39 }
 0x5c9   : > { %v2682_v59 = vadd.f32 %v2647_v48, %v2586_v47  ;;  %v2649_v10 = vpop.permute.xlu1 %2648 }
 0x5ca   : > { %v2587_v55 = vmul.f32 %v4509_v32, %v2555_v9  ;;  %v2651_v29 = vpop.permute.xlu0 %2650 }
 0x5cb   : > { %2714 = vst [vmem:[%s4343_s15 + $0xe0] sm:$0xff] %v2682_v59  ;;  %v2684_v56 = vadd.f32 %v2651_v29, %v2588_v17 }
 0x5cc   : > { %v2683_v57 = vadd.f32 %v2649_v10, %v2587_v55 }
 0x5cd   : > { %2716 = vst [vmem:[%s4343_s15 + $0xf0] sm:$0xff] %v2684_v56  ;;  %v2653_v58 = vpop.permute.xlu1 %2652 }
 0x5ce   : > { %2715 = vst [vmem:[%s4343_s15 + $0xe8] sm:$0xff] %v2683_v57  ;;  %v2685_v51 = vadd.f32 %v2653_v58, %v2589_v14 }
 0x5d0   : > { %2717 = vst [vmem:[%s4343_s15 + $0xf8] sm:$0xff] %v2685_v51 }
 0x5d1 PF: > { %s23_s25 = sadd.s32 1, %s3595_s25  }
 0x5d2   : > { %p20_p4 = scmp.ge.s32.totalorder %s23_s25, 4  }
 0x5d4   :  { %22 = sbr.rel (!%p20_p4) target bundleno = 1 (0x1), region = 102 }

</bundles_post_ra>
